<compile_context>
chip_gen: v6e
topology: v6e:2x2x1
jax: 0.10.0
libtpu: 0.0.40
codegen_flags: <defaults>
</compile_context>

<pallas_src>
import math
import functools

import jax
import jax.numpy as jnp
from jax.experimental import pallas as pl
from jax.experimental.pallas import tpu as pltpu


# ------------------------------ parameter prep --------------------------------

def prepare_mha_params(params):
    """Hoisted, call-once weight prep: fuse Q/K/V and pre-transpose for the MXU.

    params: (wq, bq, wk, bk, wv, bv, wo, bo) with w* of shape (E, E), b* (E,).
    Returns (w_in_t (E,3E), b_in (1,3E), wo_t (E,E), bo (1,E)).
    """
    wq, bq, wk, bk, wv, bv, wo, bo = params
    w_in_t = jnp.concatenate([wq.T, wk.T, wv.T], axis=1)        # (E, 3E)
    b_in = jnp.concatenate([bq, bk, bv]).reshape(1, -1)         # (1, 3E)
    wo_t = jnp.transpose(wo)                                    # (E, E)
    bo2 = bo.reshape(1, -1)                                     # (1, E)
    return (w_in_t, b_in, wo_t, bo2)


# --------------------------------- kernels -------------------------------------

def _softmax_rows(s):
    """Numerically stable softmax along the last axis; recip via EUP + 1 Newton step."""
    s = s - jnp.max(s, axis=-1, keepdims=True)
    p = jnp.exp(s)
    d = jnp.sum(p, axis=-1, keepdims=True)
    r = pl.reciprocal(d, approx=True)
    r = r * (2.0 - d * r)            # one Newton-Raphson step -> ~f32 accuracy
    return p * r


def _attention_core(q3, k3, v3, wo_t, bo, attn_ref, slab_ref, *, num_heads, head_dim):
    """q3: (Bblk,T,E), k3/v3: (Bblk,S,E) already projected.  wo_t: (E,E), bo: (1,E).

    Per-head attention; each head's PV result is written straight into the
    VMEM-resident slab (the heads out block or a scratch slab) -- no concat.
    """
    bblk, T, E = q3.shape
    scale = 1.0 / math.sqrt(head_dim)

    for h in range(num_heads):                       # static unroll, H small
        lo = h * head_dim
        hi = lo + head_dim
        score = jnp.einsum("btd,bsd->bts", q3[:, :, lo:hi], k3[:, :, lo:hi],
                           preferred_element_type=jnp.float32) * scale   # (Bblk,T,S)
        # TODO(synk): attn_mask / key_padding_mask additions would go here
        # (reference call path passes None; attention_dropout=0.0 -> identity).
        alpha = _softmax_rows(score)
        slab_ref[:, :, lo:hi] = jnp.einsum("bts,bsd->btd", alpha, v3[:, :, lo:hi],
                                           preferred_element_type=jnp.float32)

    # One dense read of the slab, one fat (Bblk*T, E) @ (E, E) output projection.
    heads2d = slab_ref[...].reshape(bblk * T, E)
    out = jnp.dot(heads2d, wo_t, preferred_element_type=jnp.float32) + bo
    attn_ref[...] = out.reshape(bblk, T, E)


def _mha_self_kernel(x_ref, w_in_ref, b_in_ref, wo_t_ref, bo_ref,
                     attn_ref, slab_ref, *, num_heads, head_dim):
    """Self-attention: fused QKV projection as one (Bblk*T, E) @ (E, 3E) matmul."""
    bblk, T, E = x_ref.shape
    x2 = x_ref[...].reshape(bblk * T, E)
    qkv = jnp.dot(x2, w_in_ref[...], preferred_element_type=jnp.float32) + b_in_ref[...]
    qkv3 = qkv.reshape(bblk, T, 3 * E)
    _attention_core(qkv3[:, :, :E], qkv3[:, :, E:2 * E], qkv3[:, :, 2 * E:],
                    wo_t_ref[...], bo_ref[...], attn_ref, slab_ref,
                    num_heads=num_heads, head_dim=head_dim)


def _mha_cross_kernel(xq_ref, xk_ref, xv_ref, w_in_ref, b_in_ref, wo_t_ref, bo_ref,
                      attn_ref, slab_ref, *, num_heads, head_dim):
    """General path (distinct query / key / value sources, e.g. encoder-decoder)."""
    bblk, T, E = xq_ref.shape
    S = xk_ref.shape[1]
    w_in = w_in_ref[...]
    b_in = b_in_ref[...]
    q = (jnp.dot(xq_ref[...].reshape(bblk * T, E), w_in[:, :E],
                 preferred_element_type=jnp.float32) + b_in[:, :E]).reshape(bblk, T, E)
    k = (jnp.dot(xk_ref[...].reshape(bblk * S, E), w_in[:, E:2 * E],
                 preferred_element_type=jnp.float32) + b_in[:, E:2 * E]).reshape(bblk, S, E)
    v = (jnp.dot(xv_ref[...].reshape(bblk * S, E), w_in[:, 2 * E:],
                 preferred_element_type=jnp.float32) + b_in[:, 2 * E:]).reshape(bblk, S, E)
    _attention_core(q, k, v, wo_t_ref[...], bo_ref[...], attn_ref, slab_ref,
                    num_heads=num_heads, head_dim=head_dim)


# --------------------------------- wrapper --------------------------------------

def _pick_block_batch(B):
    # 2 parallel grid steps when B splits evenly (both v7x TensorCores busy);
    # otherwise one fat step (best for single-TC v5e / v6e).
    if B >= 2 and B % 2 == 0:
        return B // 2
    return B


def multi_head_attention(query, key, value, params, num_heads, *,
                         need_weights=True, self_attention=None,
                         block_batch=None, time_major=True):
    """Forward pass matching the PyTorch MultiHeadAttention module.

    time_major=True (PyTorch convention): query (T,B,E), key/value (S,B,E);
        returns attn (T,B,E).
    time_major=False: query (B,T,E), key/value (B,S,E); returns attn (B,T,E)
        and skips all wrapper-side transposes.
    attn_weights (when need_weights) is always (H,B,T,hd), i.e. the per-head
    attention outputs `attention.transpose(0,1)` of the reference; None otherwise.

    params: either the raw 8-tuple (wq,bq,wk,bk,wv,bv,wo,bo) or the 4-tuple from
    prepare_mha_params() (pass the latter to avoid re-doing weight prep per call).
    """
    if len(params) == 8:
        params = prepare_mha_params(params)
    w_in_t, b_in, wo_t, bo2 = params
    E = wo_t.shape[0]
    hd = E // num_heads

    if self_attention is None:
        self_attention = (query is key) and (key is value)

    # Batch-major view so (T/S, E) are the tile-aligned trailing block dims.
    qb = jnp.transpose(query, (1, 0, 2)) if time_major else query
    B, T, _ = qb.shape
    if self_attention:
        kb = vb = None
        S = T
    else:
        kb = jnp.transpose(key, (1, 0, 2)) if time_major else key
        vb = jnp.transpose(value, (1, 0, 2)) if time_major else value
        S = kb.shape[1]

    bblk = block_batch
    if bblk is None or bblk <= 0 or B % bblk != 0:
        bblk = _pick_block_batch(B)
    grid = (B // bblk,)

    # Constant-index weight blocks: DMA'd once by the pipeliner.
    # TODO(synk): add pipeline_mode=pl.Buffered(1) here once verified, to free
    # the second (unused) VMEM weight buffer at large E.
    weight_specs = [
        pl.BlockSpec((E, 3 * E), lambda g: (0, 0)),     # [Wq|Wk|Wv].T
        pl.BlockSpec((1, 3 * E), lambda g: (0, 0)),     # [bq|bk|bv]
        pl.BlockSpec((E, E), lambda g: (0, 0)),         # Wo.T
        pl.BlockSpec((1, E), lambda g: (0, 0)),         # bo
    ]

    if self_attention:
        kernel = functools.partial(_mha_self_kernel, num_heads=num_heads, head_dim=hd)
        inputs = (qb, w_in_t, b_in, wo_t, bo2)
        in_specs = [pl.BlockSpec((bblk, T, E), lambda g: (g, 0, 0))] + weight_specs
    else:
        kernel = functools.partial(_mha_cross_kernel, num_heads=num_heads, head_dim=hd)
        inputs = (qb, kb, vb, w_in_t, b_in, wo_t, bo2)
        in_specs = [pl.BlockSpec((bblk, T, E), lambda g: (g, 0, 0)),
                    pl.BlockSpec((bblk, S, E), lambda g: (g, 0, 0)),
                    pl.BlockSpec((bblk, S, E), lambda g: (g, 0, 0))] + weight_specs

    out_block = pl.BlockSpec((bblk, T, E), lambda g: (g, 0, 0))
    if need_weights:
        out_shape = (jax.ShapeDtypeStruct((B, T, E), jnp.float32),   # attn
                     jax.ShapeDtypeStruct((B, T, E), jnp.float32))   # heads, lane-dense
        out_specs = [out_block, out_block]
        scratch_shapes = []
    else:
        out_shape = jax.ShapeDtypeStruct((B, T, E), jnp.float32)
        out_specs = out_block
        scratch_shapes = [pltpu.VMEM((bblk, T, E), jnp.float32)]     # heads slab

    # Explicit VMEM budget (double-buffered blocks + weights + intermediates),
    # clamped to stay within v7x's 64 MiB physical VMEM.
    itemsize = 4
    est = itemsize * (
        2 * bblk * T * E                                   # query block x2
        + (0 if self_attention else 2 * 2 * bblk * S * E)  # key/value blocks x2
        + 2 * (E * 3 * E + 3 * E + E * E + E)              # weights x2
        + (2 if need_weights else 1) * 2 * bblk * T * E    # output block(s) x2
        + bblk * T * E                                     # heads slab / scratch
        + bblk * T * 3 * E                                 # qkv intermediate
        + 4 * bblk * T * S                                 # score/exp/alpha live set
    )
    vmem_limit = int(min(max(2 * est, 32 * 1024 * 1024), 64 * 1024 * 1024))

    result = pl.pallas_call(
        kernel,
        out_shape=out_shape,
        grid_spec=pltpu.PrefetchScalarGridSpec(
            num_scalar_prefetch=0,
            grid=grid,
            in_specs=in_specs,
            out_specs=out_specs,
            scratch_shapes=scratch_shapes,
        ),
        compiler_params=pltpu.CompilerParams(
            dimension_semantics=("parallel",),
            vmem_limit_bytes=vmem_limit,
        ),
    )(*inputs)

    if need_weights:
        attn_b, heads_b = result
    else:
        attn_b, heads_b = result, None

    attn = jnp.transpose(attn_b, (1, 0, 2)) if time_major else attn_b
    attn_weights = None
    if need_weights:
        # Layout plumbing back to the PyTorch (H, B, T, hd) convention.
        attn_weights = jnp.transpose(heads_b.reshape(B, T, num_heads, hd), (2, 0, 1, 3))
    return attn, attn_weights


# ----------------------------- reference & test ---------------------------------

def _xavier_uniform(key, shape, gain=1.0):
    fan_out, fan_in = shape
    bound = gain * math.sqrt(6.0 / (fan_in + fan_out))
    return jax.random.uniform(key, shape, jnp.float32, -bound, bound)


def _reference(query, key, value, params, num_heads):
    """Pure-JAX reference mirroring the PyTorch forward (time-major inputs)."""
    T, B, E = query.shape
    hd = E // num_heads
    wq, bq, wk, bk, wv, bv, wo, bo = params
    q = query @ wq.T + bq
    k = key @ wk.T + bk
    v = value @ wv.T + bv

    def split_heads(x):  # (L, B, E) -> (B, H, L, hd)
        L = x.shape[0]
        return jnp.transpose(x, (1, 0, 2)).reshape(B, L, num_heads, hd).transpose(0, 2, 1, 3)

    qh, kh, vh = split_heads(q), split_heads(k), split_heads(v)
    score = jnp.einsum("bhtd,bhsd->bhts", qh, kh) / math.sqrt(hd)
    alpha = jax.nn.softmax(score, axis=-1)
    attention = jnp.einsum("bhts,bhsd->bhtd", alpha, vh)           # (B, H, T, hd)
    attn = jnp.transpose(attention, (2, 0, 1, 3)).reshape(T, B, E) @ wo.T + bo
    attn_weights = jnp.transpose(attention, (1, 0, 2, 3))          # (H, B, T, hd)
    return attn, attn_weights


if __name__ == "__main__":
    T, B, E, H = 8, 8, 32, 4      # B=8 -> Bblk=4, grid=(2,): exercises batch folding
    S = 16                        # source length for the cross-attention check

    root = jax.random.PRNGKey(0)
    ks = jax.random.split(root, 10)
    gain = 1.0 / math.sqrt(2.0)
    wk_ = _xavier_uniform(ks[0], (E, E), gain)
    wv_ = _xavier_uniform(ks[1], (E, E), gain)
    wq_ = _xavier_uniform(ks[2], (E, E), gain)
    wo_ = _xavier_uniform(ks[3], (E, E), 1.0)
    lim = 1.0 / math.sqrt(E)
    bk_ = jax.random.uniform(ks[4], (E,), jnp.float32, -lim, lim)
    bv_ = jax.random.uniform(ks[5], (E,), jnp.float32, -lim, lim)
    bq_ = jax.random.uniform(ks[6], (E,), jnp.float32, -lim, lim)
    bo_ = jnp.zeros((E,), jnp.float32)
    raw_params = (wq_, bq_, wk_, bk_, wv_, bv_, wo_, bo_)

    # Weight prep hoisted out of the per-call path (done once).
    prepared = prepare_mha_params(raw_params)
    prepared = jax.tree_util.tree_map(jax.block_until_ready, prepared)

    # --- self-attention (fused QKV path), time-major like the PyTorch module ---
    x = jax.random.normal(ks[7], (T, B, E), jnp.float32)     # (T, B, E)
    attn, attn_w = multi_head_attention(x, x, x, prepared, H)
    attn = jax.block_until_ready(attn)
    attn_w = jax.block_until_ready(attn_w)

    ref_attn, ref_w = _reference(x, x, x, raw_params, H)
    assert attn.shape == (T, B, E) and attn_w.shape == (H, B, T, E // H)
    assert jnp.allclose(attn, ref_attn, atol=1e-4, rtol=1e-4)
    assert jnp.allclose(attn_w, ref_w, atol=1e-4, rtol=1e-4)

    # --- need_weights=False: single output, no heads writeback -----------------
    attn_nw, w_none = multi_head_attention(x, x, x, prepared, H, need_weights=False)
    attn_nw = jax.block_until_ready(attn_nw)
    assert w_none is None
    assert jnp.allclose(attn_nw, ref_attn, atol=1e-4, rtol=1e-4)

    # --- general path (distinct key/value sources, S != T) ---------------------
    xk = jax.random.normal(ks[8], (S, B, E), jnp.float32)
    xv = jax.random.normal(ks[9], (S, B, E), jnp.float32)
    attn2, attn_w2 = multi_head_attention(x, xk, xv, prepared, H)
    attn2 = jax.block_until_ready(attn2)
    attn_w2 = jax.block_until_ready(attn_w2)

    ref_attn2, ref_w2 = _reference(x, xk, xv, raw_params, H)
    assert attn2.shape == (T, B, E) and attn_w2.shape == (H, B, T, E // H)
    assert jnp.allclose(attn2, ref_attn2, atol=1e-4, rtol=1e-4)
    assert jnp.allclose(attn_w2, ref_w2, atol=1e-4, rtol=1e-4)

    # --- batch-major path: no wrapper-side transposes ---------------------------
    xb = jnp.transpose(x, (1, 0, 2))                          # (B, T, E)
    attn_bm, attn_w_bm = multi_head_attention(xb, xb, xb, prepared, H,
                                              time_major=False)
    attn_bm = jax.block_until_ready(attn_bm)
    assert attn_bm.shape == (B, T, E)
    assert jnp.allclose(attn_bm, jnp.transpose(ref_attn, (1, 0, 2)), atol=1e-4, rtol=1e-4)
    assert jnp.allclose(attn_w_bm, ref_w, atol=1e-4, rtol=1e-4)

    print("KERNEL_OK")
</pallas_src>

<mosaic_0001>
module attributes {stable_mosaic.version = 11 : i64} {
  func.func @_mha_self_kernel(%arg0: i32, %arg1: memref<4x8x32xf32, #tpu.memory_space<vmem>>, %arg2: memref<32x96xf32, #tpu.memory_space<vmem>>, %arg3: memref<1x96xf32, #tpu.memory_space<vmem>>, %arg4: memref<32x32xf32, #tpu.memory_space<vmem>>, %arg5: memref<1x32xf32, #tpu.memory_space<vmem>>, %arg6: memref<4x8x32xf32, #tpu.memory_space<vmem>>, %arg7: memref<4x8x32xf32, #tpu.memory_space<vmem>>) attributes {dimension_semantics = [#tpu.dimension_semantics<parallel>], iteration_bounds = array<i64: 2>, scalar_prefetch = 0 : i64, scratch_operands = 0 : i64, tpu.core_type = #tpu.core_type<tc>, window_params = [{transform_indices = @transform_0, window_bounds = array<i64: 4, 8, 32>}, {pipeline_mode = #tpu.pipeline_mode<synchronous>, transform_indices = @transform_1, window_bounds = array<i64: 32, 96>}, {pipeline_mode = #tpu.pipeline_mode<synchronous>, transform_indices = @transform_2, window_bounds = array<i64: 1, 96>}, {pipeline_mode = #tpu.pipeline_mode<synchronous>, transform_indices = @transform_3, window_bounds = array<i64: 32, 32>}, {pipeline_mode = #tpu.pipeline_mode<synchronous>, transform_indices = @transform_4, window_bounds = array<i64: 1, 32>}, {transform_indices = @transform_5, window_bounds = array<i64: 4, 8, 32>}, {transform_indices = @transform_6, window_bounds = array<i64: 4, 8, 32>}]} {
    %c0 = arith.constant 0 : index
    %c0_0 = arith.constant 0 : index
    %c0_1 = arith.constant 0 : index
    %0 = vector.load %arg1[%c0, %c0_0, %c0_1] : memref<4x8x32xf32, #tpu.memory_space<vmem>>, vector<4x8x32xf32>
    %1 = vector.shape_cast %0 : vector<4x8x32xf32> to vector<32x32xf32>
    %c0_2 = arith.constant 0 : index
    %c0_3 = arith.constant 0 : index
    %2 = vector.load %arg2[%c0_2, %c0_3] : memref<32x96xf32, #tpu.memory_space<vmem>>, vector<32x96xf32>
    %cst = arith.constant dense<0.000000e+00> : vector<32x96xf32>
    %3 = tpu.matmul %1, %2, %cst {dimension_numbers = #tpu.dot_dimension_numbers<[1], [0], [0], [1], [0, 0, 1, 1], [], []>} : vector<32x32xf32>, vector<32x96xf32>, vector<32x96xf32> -> vector<32x96xf32>
    %c0_4 = arith.constant 0 : index
    %c0_5 = arith.constant 0 : index
    %4 = vector.load %arg3[%c0_4, %c0_5] : memref<1x96xf32, #tpu.memory_space<vmem>>, vector<1x96xf32>
    %5 = vector.broadcast %4 : vector<1x96xf32> to vector<32x96xf32>
    %6 = arith.addf %3, %5 : vector<32x96xf32>
    %7 = vector.shape_cast %6 : vector<32x96xf32> to vector<4x8x96xf32>
    %8 = vector.extract_strided_slice %7 {offsets = [0, 0, 0], sizes = [4, 8, 32], strides = [1, 1, 1]} : vector<4x8x96xf32> to vector<4x8x32xf32>
    %9 = vector.extract_strided_slice %7 {offsets = [0, 0, 32], sizes = [4, 8, 32], strides = [1, 1, 1]} : vector<4x8x96xf32> to vector<4x8x32xf32>
    %10 = vector.extract_strided_slice %7 {offsets = [0, 0, 64], sizes = [4, 8, 32], strides = [1, 1, 1]} : vector<4x8x96xf32> to vector<4x8x32xf32>
    %c0_6 = arith.constant 0 : index
    %c0_7 = arith.constant 0 : index
    %11 = vector.load %arg4[%c0_6, %c0_7] : memref<32x32xf32, #tpu.memory_space<vmem>>, vector<32x32xf32>
    %c0_8 = arith.constant 0 : index
    %c0_9 = arith.constant 0 : index
    %12 = vector.load %arg5[%c0_8, %c0_9] : memref<1x32xf32, #tpu.memory_space<vmem>>, vector<1x32xf32>
    %13 = vector.extract_strided_slice %8 {offsets = [0, 0, 0], sizes = [4, 8, 8], strides = [1, 1, 1]} : vector<4x8x32xf32> to vector<4x8x8xf32>
    %14 = vector.extract_strided_slice %9 {offsets = [0, 0, 0], sizes = [4, 8, 8], strides = [1, 1, 1]} : vector<4x8x32xf32> to vector<4x8x8xf32>
    "tpu.trace_start"() <{level = 10 : i32, message = "btd,bsd->bts"}> : () -> ()
    %cst_10 = arith.constant dense<0.000000e+00> : vector<4x8x8xf32>
    %15 = tpu.matmul %13, %14, %cst_10 {dimension_numbers = #tpu.dot_dimension_numbers<[2], [2], [1], [1], [0, 0, 0, 1, 1, 1], [0], [0]>} : vector<4x8x8xf32>, vector<4x8x8xf32>, vector<4x8x8xf32> -> vector<4x8x8xf32>
    "tpu.trace_stop"() : () -> ()
    %cst_11 = arith.constant 0.353553385 : f32
    %16 = vector.broadcast %cst_11 : f32 to vector<4x8x8xf32>
    %17 = arith.mulf %15, %16 : vector<4x8x8xf32>
    %cst_12 = arith.constant dense<0xFF800000> : vector<4x8xf32>
    %18 = vector.multi_reduction <maximumf>, %17, %cst_12 [2] : vector<4x8x8xf32> to vector<4x8xf32>
    %19 = vector.shape_cast %18 : vector<4x8xf32> to vector<4x8x1xf32>
    %20 = vector.broadcast %19 : vector<4x8x1xf32> to vector<4x8x8xf32>
    %21 = arith.subf %17, %20 : vector<4x8x8xf32>
    %22 = math.exp %21 : vector<4x8x8xf32>
    %cst_13 = arith.constant dense<0.000000e+00> : vector<4x8xf32>
    %23 = vector.multi_reduction <add>, %22, %cst_13 [2] : vector<4x8x8xf32> to vector<4x8xf32>
    %24 = vector.shape_cast %23 : vector<4x8xf32> to vector<4x8x1xf32>
    %25 = tpu.reciprocal %24 {approx = true} : vector<4x8x1xf32> -> vector<4x8x1xf32>
    %26 = arith.mulf %24, %25 : vector<4x8x1xf32>
    %cst_14 = arith.constant 2.000000e+00 : f32
    %27 = vector.broadcast %cst_14 : f32 to vector<4x8x1xf32>
    %28 = arith.subf %27, %26 : vector<4x8x1xf32>
    %29 = arith.mulf %25, %28 : vector<4x8x1xf32>
    %30 = vector.broadcast %29 : vector<4x8x1xf32> to vector<4x8x8xf32>
    %31 = arith.mulf %22, %30 : vector<4x8x8xf32>
    %32 = vector.extract_strided_slice %10 {offsets = [0, 0, 0], sizes = [4, 8, 8], strides = [1, 1, 1]} : vector<4x8x32xf32> to vector<4x8x8xf32>
    "tpu.trace_start"() <{level = 10 : i32, message = "bts,bsd->btd"}> : () -> ()
    %cst_15 = arith.constant dense<0.000000e+00> : vector<4x8x8xf32>
    %33 = tpu.matmul %31, %32, %cst_15 {dimension_numbers = #tpu.dot_dimension_numbers<[2], [1], [1], [2], [0, 0, 0, 1, 1, 2], [0], [0]>} : vector<4x8x8xf32>, vector<4x8x8xf32>, vector<4x8x8xf32> -> vector<4x8x8xf32>
    "tpu.trace_stop"() : () -> ()
    %c0_16 = arith.constant 0 : index
    %c0_17 = arith.constant 0 : index
    %c0_18 = arith.constant 0 : index
    %34 = vector.load %arg7[%c0_16, %c0_17, %c0_18] : memref<4x8x32xf32, #tpu.memory_space<vmem>>, vector<4x8x8xf32>
    tpu.vector_store %arg7[%c0_16, %c0_17, %c0_18], %33 {strides = array<i32>} : memref<4x8x32xf32, #tpu.memory_space<vmem>>, vector<4x8x8xf32>,
    %35 = vector.extract_strided_slice %8 {offsets = [0, 0, 8], sizes = [4, 8, 8], strides = [1, 1, 1]} : vector<4x8x32xf32> to vector<4x8x8xf32>
    %36 = vector.extract_strided_slice %9 {offsets = [0, 0, 8], sizes = [4, 8, 8], strides = [1, 1, 1]} : vector<4x8x32xf32> to vector<4x8x8xf32>
    "tpu.trace_start"() <{level = 10 : i32, message = "btd,bsd->bts"}> : () -> ()
    %cst_19 = arith.constant dense<0.000000e+00> : vector<4x8x8xf32>
    %37 = tpu.matmul %35, %36, %cst_19 {dimension_numbers = #tpu.dot_dimension_numbers<[2], [2], [1], [1], [0, 0, 0, 1, 1, 1], [0], [0]>} : vector<4x8x8xf32>, vector<4x8x8xf32>, vector<4x8x8xf32> -> vector<4x8x8xf32>
    "tpu.trace_stop"() : () -> ()
    %cst_20 = arith.constant 0.353553385 : f32
    %38 = vector.broadcast %cst_20 : f32 to vector<4x8x8xf32>
    %39 = arith.mulf %37, %38 : vector<4x8x8xf32>
    %cst_21 = arith.constant dense<0xFF800000> : vector<4x8xf32>
    %40 = vector.multi_reduction <maximumf>, %39, %cst_21 [2] : vector<4x8x8xf32> to vector<4x8xf32>
    %41 = vector.shape_cast %40 : vector<4x8xf32> to vector<4x8x1xf32>
    %42 = vector.broadcast %41 : vector<4x8x1xf32> to vector<4x8x8xf32>
    %43 = arith.subf %39, %42 : vector<4x8x8xf32>
    %44 = math.exp %43 : vector<4x8x8xf32>
    %cst_22 = arith.constant dense<0.000000e+00> : vector<4x8xf32>
    %45 = vector.multi_reduction <add>, %44, %cst_22 [2] : vector<4x8x8xf32> to vector<4x8xf32>
    %46 = vector.shape_cast %45 : vector<4x8xf32> to vector<4x8x1xf32>
    %47 = tpu.reciprocal %46 {approx = true} : vector<4x8x1xf32> -> vector<4x8x1xf32>
    %48 = arith.mulf %46, %47 : vector<4x8x1xf32>
    %cst_23 = arith.constant 2.000000e+00 : f32
    %49 = vector.broadcast %cst_23 : f32 to vector<4x8x1xf32>
    %50 = arith.subf %49, %48 : vector<4x8x1xf32>
    %51 = arith.mulf %47, %50 : vector<4x8x1xf32>
    %52 = vector.broadcast %51 : vector<4x8x1xf32> to vector<4x8x8xf32>
    %53 = arith.mulf %44, %52 : vector<4x8x8xf32>
    %54 = vector.extract_strided_slice %10 {offsets = [0, 0, 8], sizes = [4, 8, 8], strides = [1, 1, 1]} : vector<4x8x32xf32> to vector<4x8x8xf32>
    "tpu.trace_start"() <{level = 10 : i32, message = "bts,bsd->btd"}> : () -> ()
    %cst_24 = arith.constant dense<0.000000e+00> : vector<4x8x8xf32>
    %55 = tpu.matmul %53, %54, %cst_24 {dimension_numbers = #tpu.dot_dimension_numbers<[2], [1], [1], [2], [0, 0, 0, 1, 1, 2], [0], [0]>} : vector<4x8x8xf32>, vector<4x8x8xf32>, vector<4x8x8xf32> -> vector<4x8x8xf32>
    "tpu.trace_stop"() : () -> ()
    %c0_25 = arith.constant 0 : index
    %c0_26 = arith.constant 0 : index
    %c8 = arith.constant 8 : index
    %56 = vector.load %arg7[%c0_25, %c0_26, %c8] : memref<4x8x32xf32, #tpu.memory_space<vmem>>, vector<4x8x8xf32>
    tpu.vector_store %arg7[%c0_25, %c0_26, %c8], %55 {strides = array<i32>} : memref<4x8x32xf32, #tpu.memory_space<vmem>>, vector<4x8x8xf32>,
    %57 = vector.extract_strided_slice %8 {offsets = [0, 0, 16], sizes = [4, 8, 8], strides = [1, 1, 1]} : vector<4x8x32xf32> to vector<4x8x8xf32>
    %58 = vector.extract_strided_slice %9 {offsets = [0, 0, 16], sizes = [4, 8, 8], strides = [1, 1, 1]} : vector<4x8x32xf32> to vector<4x8x8xf32>
    "tpu.trace_start"() <{level = 10 : i32, message = "btd,bsd->bts"}> : () -> ()
    %cst_27 = arith.constant dense<0.000000e+00> : vector<4x8x8xf32>
    %59 = tpu.matmul %57, %58, %cst_27 {dimension_numbers = #tpu.dot_dimension_numbers<[2], [2], [1], [1], [0, 0, 0, 1, 1, 1], [0], [0]>} : vector<4x8x8xf32>, vector<4x8x8xf32>, vector<4x8x8xf32> -> vector<4x8x8xf32>
    "tpu.trace_stop"() : () -> ()
    %cst_28 = arith.constant 0.353553385 : f32
    %60 = vector.broadcast %cst_28 : f32 to vector<4x8x8xf32>
    %61 = arith.mulf %59, %60 : vector<4x8x8xf32>
    %cst_29 = arith.constant dense<0xFF800000> : vector<4x8xf32>
    %62 = vector.multi_reduction <maximumf>, %61, %cst_29 [2] : vector<4x8x8xf32> to vector<4x8xf32>
    %63 = vector.shape_cast %62 : vector<4x8xf32> to vector<4x8x1xf32>
    %64 = vector.broadcast %63 : vector<4x8x1xf32> to vector<4x8x8xf32>
    %65 = arith.subf %61, %64 : vector<4x8x8xf32>
    %66 = math.exp %65 : vector<4x8x8xf32>
    %cst_30 = arith.constant dense<0.000000e+00> : vector<4x8xf32>
    %67 = vector.multi_reduction <add>, %66, %cst_30 [2] : vector<4x8x8xf32> to vector<4x8xf32>
    %68 = vector.shape_cast %67 : vector<4x8xf32> to vector<4x8x1xf32>
    %69 = tpu.reciprocal %68 {approx = true} : vector<4x8x1xf32> -> vector<4x8x1xf32>
    %70 = arith.mulf %68, %69 : vector<4x8x1xf32>
    %cst_31 = arith.constant 2.000000e+00 : f32
    %71 = vector.broadcast %cst_31 : f32 to vector<4x8x1xf32>
    %72 = arith.subf %71, %70 : vector<4x8x1xf32>
    %73 = arith.mulf %69, %72 : vector<4x8x1xf32>
    %74 = vector.broadcast %73 : vector<4x8x1xf32> to vector<4x8x8xf32>
    %75 = arith.mulf %66, %74 : vector<4x8x8xf32>
    %76 = vector.extract_strided_slice %10 {offsets = [0, 0, 16], sizes = [4, 8, 8], strides = [1, 1, 1]} : vector<4x8x32xf32> to vector<4x8x8xf32>
    "tpu.trace_start"() <{level = 10 : i32, message = "bts,bsd->btd"}> : () -> ()
    %cst_32 = arith.constant dense<0.000000e+00> : vector<4x8x8xf32>
    %77 = tpu.matmul %75, %76, %cst_32 {dimension_numbers = #tpu.dot_dimension_numbers<[2], [1], [1], [2], [0, 0, 0, 1, 1, 2], [0], [0]>} : vector<4x8x8xf32>, vector<4x8x8xf32>, vector<4x8x8xf32> -> vector<4x8x8xf32>
    "tpu.trace_stop"() : () -> ()
    %c0_33 = arith.constant 0 : index
    %c0_34 = arith.constant 0 : index
    %c16 = arith.constant 16 : index
    %78 = vector.load %arg7[%c0_33, %c0_34, %c16] : memref<4x8x32xf32, #tpu.memory_space<vmem>>, vector<4x8x8xf32>
    tpu.vector_store %arg7[%c0_33, %c0_34, %c16], %77 {strides = array<i32>} : memref<4x8x32xf32, #tpu.memory_space<vmem>>, vector<4x8x8xf32>,
    %79 = vector.extract_strided_slice %8 {offsets = [0, 0, 24], sizes = [4, 8, 8], strides = [1, 1, 1]} : vector<4x8x32xf32> to vector<4x8x8xf32>
    %80 = vector.extract_strided_slice %9 {offsets = [0, 0, 24], sizes = [4, 8, 8], strides = [1, 1, 1]} : vector<4x8x32xf32> to vector<4x8x8xf32>
    "tpu.trace_start"() <{level = 10 : i32, message = "btd,bsd->bts"}> : () -> ()
    %cst_35 = arith.constant dense<0.000000e+00> : vector<4x8x8xf32>
    %81 = tpu.matmul %79, %80, %cst_35 {dimension_numbers = #tpu.dot_dimension_numbers<[2], [2], [1], [1], [0, 0, 0, 1, 1, 1], [0], [0]>} : vector<4x8x8xf32>, vector<4x8x8xf32>, vector<4x8x8xf32> -> vector<4x8x8xf32>
    "tpu.trace_stop"() : () -> ()
    %cst_36 = arith.constant 0.353553385 : f32
    %82 = vector.broadcast %cst_36 : f32 to vector<4x8x8xf32>
    %83 = arith.mulf %81, %82 : vector<4x8x8xf32>
    %cst_37 = arith.constant dense<0xFF800000> : vector<4x8xf32>
    %84 = vector.multi_reduction <maximumf>, %83, %cst_37 [2] : vector<4x8x8xf32> to vector<4x8xf32>
    %85 = vector.shape_cast %84 : vector<4x8xf32> to vector<4x8x1xf32>
    %86 = vector.broadcast %85 : vector<4x8x1xf32> to vector<4x8x8xf32>
    %87 = arith.subf %83, %86 : vector<4x8x8xf32>
    %88 = math.exp %87 : vector<4x8x8xf32>
    %cst_38 = arith.constant dense<0.000000e+00> : vector<4x8xf32>
    %89 = vector.multi_reduction <add>, %88, %cst_38 [2] : vector<4x8x8xf32> to vector<4x8xf32>
    %90 = vector.shape_cast %89 : vector<4x8xf32> to vector<4x8x1xf32>
    %91 = tpu.reciprocal %90 {approx = true} : vector<4x8x1xf32> -> vector<4x8x1xf32>
    %92 = arith.mulf %90, %91 : vector<4x8x1xf32>
    %cst_39 = arith.constant 2.000000e+00 : f32
    %93 = vector.broadcast %cst_39 : f32 to vector<4x8x1xf32>
    %94 = arith.subf %93, %92 : vector<4x8x1xf32>
    %95 = arith.mulf %91, %94 : vector<4x8x1xf32>
    %96 = vector.broadcast %95 : vector<4x8x1xf32> to vector<4x8x8xf32>
    %97 = arith.mulf %88, %96 : vector<4x8x8xf32>
    %98 = vector.extract_strided_slice %10 {offsets = [0, 0, 24], sizes = [4, 8, 8], strides = [1, 1, 1]} : vector<4x8x32xf32> to vector<4x8x8xf32>
    "tpu.trace_start"() <{level = 10 : i32, message = "bts,bsd->btd"}> : () -> ()
    %cst_40 = arith.constant dense<0.000000e+00> : vector<4x8x8xf32>
    %99 = tpu.matmul %97, %98, %cst_40 {dimension_numbers = #tpu.dot_dimension_numbers<[2], [1], [1], [2], [0, 0, 0, 1, 1, 2], [0], [0]>} : vector<4x8x8xf32>, vector<4x8x8xf32>, vector<4x8x8xf32> -> vector<4x8x8xf32>
    "tpu.trace_stop"() : () -> ()
    %c0_41 = arith.constant 0 : index
    %c0_42 = arith.constant 0 : index
    %c24 = arith.constant 24 : index
    %100 = vector.load %arg7[%c0_41, %c0_42, %c24] : memref<4x8x32xf32, #tpu.memory_space<vmem>>, vector<4x8x8xf32>
    tpu.vector_store %arg7[%c0_41, %c0_42, %c24], %99 {strides = array<i32>} : memref<4x8x32xf32, #tpu.memory_space<vmem>>, vector<4x8x8xf32>,
    %c0_43 = arith.constant 0 : index
    %c0_44 = arith.constant 0 : index
    %c0_45 = arith.constant 0 : index
    %101 = vector.load %arg7[%c0_43, %c0_44, %c0_45] : memref<4x8x32xf32, #tpu.memory_space<vmem>>, vector<4x8x32xf32>
    %102 = vector.shape_cast %101 : vector<4x8x32xf32> to vector<32x32xf32>
    %cst_46 = arith.constant dense<0.000000e+00> : vector<32x32xf32>
    %103 = tpu.matmul %102, %11, %cst_46 {dimension_numbers = #tpu.dot_dimension_numbers<[1], [0], [0], [1], [0, 0, 1, 1], [], []>} : vector<32x32xf32>, vector<32x32xf32>, vector<32x32xf32> -> vector<32x32xf32>
    %104 = vector.broadcast %12 : vector<1x32xf32> to vector<32x32xf32>
    %105 = arith.addf %103, %104 : vector<32x32xf32>
    %106 = vector.shape_cast %105 : vector<32x32xf32> to vector<4x8x32xf32>
    %c0_47 = arith.constant 0 : index
    %c0_48 = arith.constant 0 : index
    %c0_49 = arith.constant 0 : index
    %107 = vector.load %arg6[%c0_47, %c0_48, %c0_49] : memref<4x8x32xf32, #tpu.memory_space<vmem>>, vector<4x8x32xf32>
    tpu.vector_store %arg6[%c0_47, %c0_48, %c0_49], %106 {strides = array<i32>} : memref<4x8x32xf32, #tpu.memory_space<vmem>>, vector<4x8x32xf32>,
    return
  }
  func.func @transform_0(%arg0: i32) -> (i32, i32, i32) {
    %c0_i32 = arith.constant 0 : i32
    %c0_i32_0 = arith.constant 0 : i32
    %c0_i32_1 = arith.constant 0 : i32
    return %arg0, %c0_i32, %c0_i32_0 : i32, i32, i32
  }
  func.func @transform_1(%arg0: i32) -> (i32, i32) {
    %c0_i32 = arith.constant 0 : i32
    %c0_i32_0 = arith.constant 0 : i32
    %c0_i32_1 = arith.constant 0 : i32
    return %c0_i32, %c0_i32_0 : i32, i32
  }
  func.func @transform_2(%arg0: i32) -> (i32, i32) {
    %c0_i32 = arith.constant 0 : i32
    %c0_i32_0 = arith.constant 0 : i32
    %c0_i32_1 = arith.constant 0 : i32
    return %c0_i32, %c0_i32_0 : i32, i32
  }
  func.func @transform_3(%arg0: i32) -> (i32, i32) {
    %c0_i32 = arith.constant 0 : i32
    %c0_i32_0 = arith.constant 0 : i32
    %c0_i32_1 = arith.constant 0 : i32
    return %c0_i32, %c0_i32_0 : i32, i32
  }
  func.func @transform_4(%arg0: i32) -> (i32, i32) {
    %c0_i32 = arith.constant 0 : i32
    %c0_i32_0 = arith.constant 0 : i32
    %c0_i32_1 = arith.constant 0 : i32
    return %c0_i32, %c0_i32_0 : i32, i32
  }
  func.func @transform_5(%arg0: i32) -> (i32, i32, i32) {
    %c0_i32 = arith.constant 0 : i32
    %c0_i32_0 = arith.constant 0 : i32
    %c0_i32_1 = arith.constant 0 : i32
    return %arg0, %c0_i32, %c0_i32_0 : i32, i32, i32
  }
  func.func @transform_6(%arg0: i32) -> (i32, i32, i32) {
    %c0_i32 = arith.constant 0 : i32
    %c0_i32_0 = arith.constant 0 : i32
    %c0_i32_1 = arith.constant 0 : i32
    return %arg0, %c0_i32, %c0_i32_0 : i32, i32, i32
  }
}

</mosaic_0001>

<bundles_post_ra>
// kernel: tpu_custom_call.1
= control target key start
LH: loop header
LB: loop body
LE: loop exit
PB: predicated region body
PF: predicated region fallthrough
CT: control target
= control target key end

     0   :  { %12 = vsyncpa [#allocation3], 0  ;;  %s4783_s0 = inlined_call_operand.hbm [shape: f32[8,8,32], index: 0, kind: input, shape index: {}]   ;;  %s4784_s1 = inlined_call_operand.hbm [shape: f32[32,96], index: 1, kind: input, shape index: {}]   ;;  %s4785_s2 = inlined_call_operand.vmem [shape: f32[1,96], index: 2, kind: input, shape index: {}]   ;;  %s4786_s3 = inlined_call_operand.hbm [shape: f32[32,32], index: 3, kind: input, shape index: {}]   ;;  %s4787_s4 = inlined_call_operand.vmem [shape: f32[1,32], index: 4, kind: input, shape index: {}]   ;;  %s4788_s5 = inlined_call_operand.hbm [shape: f32[8,8,32], index: 5, kind: output, shape index: {0}]   ;;  %s4789_s6 = inlined_call_operand.hbm [shape: f32[8,8,32], index: 6, kind: output, shape index: {1}]  }
   0x1   :  { %14 = vsyncpa [#allocation3 + $0x1], 0 }
   0x2   :  { %15 = vsyncpa [#allocation6], 0 }
   0x3   :  { %16 = vsyncpa [#allocation4], 0 }
   0x4   :  { %18 = vsyncpa [#allocation4 + $0x1], 0 }
   0x5   :  { %19 = vsyncpa [#allocation10], 0 }
   0x6   :  { %21 = vsyncpa [#allocation10 + $0x1], 0  ;;  %s4214_s21 = smov 0   ;;  %s4216_s22 = smov 0  }
   0x7   :  { %s4218_s23 = smov 0   ;;  %s4220_s24 = smov 0  }
   0x8 LB: > { %s4235_s25 = sadd.s32 4294967295, %s4153_s24   ;;  %s3469_s26 = sadd.s32 4294967294, %s4153_s24   ;;  %s4153_s24 = sphi %s4220_s24, %s4816_s24   ;;  %s4149_s23 = sphi %s4218_s23, %s4815_s23   ;;  %s4145_s22 = sphi %s4216_s22, %s4814_s22   ;;  %s4141_s21 = sphi %s4214_s21, %s4813_s21  }
   0x9   : > { %p47_p0 = scmp.ne.s32.totalorder %s4145_s22, %s4141_s21  ;;  %p4790_p1 = scmp.eq.s32.totalorder %s4235_s25, 0 }
   0xa   : > { %p155_p2 = scmp.eq.s32.totalorder %s4235_s25, 1  ;;  %p161_p3 = scmp.eq.s32.totalorder %s3469_s26, 1 }
   0xb   : > { %p4244_p4 = por %p4790_p1, %p47_p0  ;;  %p3470_p5 = scmp.ge.s32.totalorder %s4153_s24, 1 }
   0xc   : > { %p4249_p6 = por %p161_p3, %p47_p0  ;;  %p194_p7 = scmp.lt.s32.totalorder %s4153_s24, 3 }
   0xd   : > { %s4797_s27 = scalar_select %p4244_p4, 1, 0 }
   0xe   : > { %s4798_s28 = scalar_select %p4249_p6, 1, 0 }
   0xf   : > { %p4254_p8 = pnand %p3470_p5, %p194_p7  ;;  %s4155_s30 = smov [#allocation5]  }
  0x10   : > { %s206_s7 = sshll.u32 %s4155_s30, 4  ;;  %s4156_s9 = smov [#allocation7]   ;;  %s207_s7 = int_to_ptr.vmem [resolvable:$true] %s206_s7 }
  0x11   : > { %s4799_s29 = scalar_select %p4254_p8, 1, 0 }
  0x12   : > { %p3834_p9 = pneg %p4254_p8  ;;  %s222_s10 = sshll.u32 %s4156_s9, 4  ;;  %s223_s10 = int_to_ptr.vmem [resolvable:$true] %s222_s10 }
  0x13   : > { %s3986_s11 = scalar_lea.vmem %s207_s7, 512  ;;  %p3994_p5 = scmp.lt.s32.totalorder %s207_s7, %s207_s7 }
  0x14   : > { %p4263_p11 = pnand %p3834_p9, %p4790_p1  ;;  %p3987_p13 = scmp.ne.s32.totalorder %s207_s7, %s3986_s11 }
  0x15   : > { %p3995_p7 = scmp.lt.s32.totalorder %s3986_s11, %s3986_s11 }
  0x16   : > { %p3977_p12 = pneg %p4263_p11 }
  0x17   : > { %p3996_p10 = por %p3995_p7, %p3994_p5 }
  0x18   : > { %p3989_p0 = pnand %p3987_p13, %p3977_p12 }
  0x1a   : > { %p3990_p3 = pneg %p3989_p0 }
  0x1c   : > { %p3997_p9 = pnand %p3996_p10, %p3990_p3 }
  0x1e   : > { %4000 = shalt.err (!%p3997_p9)
}
  0x1f   : > { %s4791_s12 = smov 128   ;;  %s4792_s13 = smov 8  }
  0x20   : > { %3837 = dma.hbm_to_vmem [thread:$0]  (!%p4263_p11), %s4784_s1, 512, %s207_s7, [#allocation6], %s4791_s12, %s4791_s12, %s4792_s13  }
  0x21   : > { %s4012_s16 = scalar_lea.vmem %s223_s10, 512  ;;  %p4020_p10 = scmp.lt.s32.totalorder %s223_s10, %s223_s10 }
  0x22   : > { %p4013_p13 = scmp.ne.s32.totalorder %s223_s10, %s4012_s16  ;;  %p4021_p3 = scmp.lt.s32.totalorder %s4012_s16, %s4012_s16 }
  0x24   : > { %p4015_p0 = pnand %p4013_p13, %p3977_p12  ;;  %p4022_p7 = por %p4021_p3, %p4020_p10 }
  0x26   : > { %p4016_p5 = pneg %p4015_p0 }
  0x28   : > { %p4023_p9 = pnand %p4022_p7, %p4016_p5 }
  0x2a   : > { %4026 = shalt.err (!%p4023_p9)
}
  0x2b   : > { %3840 = dma.hbm_to_vmem [thread:$0]  (!%p4263_p11), %s4786_s3, 512, %s223_s10, [#allocation6], %s4791_s12, %s4791_s12, %s4792_s13  }
  0x2c   : > { %s4292_s19 = sadd.s32 1, %s4153_s24   ;;  %s34_s20 = sadd.s32 1, %s4149_s23 }
  0x2d   : > { %s31_s26 = ssub.s32 %s4153_s24, %s4292_s19  ;;  %p41_p12 = scmp.ne.s32.totalorder %s4149_s23, %s4145_s22 }
  0x2e   : > { %p32_p13 = scmp.eq.s32.totalorder %s31_s26, 0  ;;  %p42_p0 = scmp.eq.s32.totalorder %s4153_s24, 0 }
  0x2f   : > { %p4302_p5 = por %p155_p2, %p41_p12  ;;  %p3854_p10 = scmp.lt.s32.totalorder %s4153_s24, 2 }
  0x30   : > { %s4308_s7 = scalar_select %p32_p13, %s4149_s23, %s34_s20  }
  0x31   : > { %s4801_s30 = scalar_select %p4302_p5, 1, 0 }
  0x32   : > { %p43_p3 = por %p42_p0, %p41_p12  ;;  %s239_s8 = sand.u32 1, %s4149_s23  }
  0x33   : > { %s3474_s9 = sshll.u32 %s239_s8, 5  ;;  %s3549_s10 = sshll.u32 %s4153_s24, 9 }
  0x34   : > { %s4315_s15 = scalar_lea.hbm %s4783_s0, %s3549_s10  ;;  %s243_s16 = scalar_lea.vmem [#allocation2], %s3474_s9 }
  0x35   : > { %s250_s17 = sshll.u32 %s243_s16, 4  ;;  %p4319_p2 = pnand %p3854_p10, %p43_p3  ;;  %s4317_s17 = int_to_ptr.vmem [resolvable:$true] %s250_s17 }
  0x36   : > { %s4323_s20 = scalar_lea.sflag [#allocation3], %s239_s8  ;;  %s4027_s26 = scalar_lea.hbm %s4315_s15, 512 }
  0x37   : > { %p4028_p11 = scmp.ne.s32.totalorder %s4315_s15, %s4027_s26  ;;  %p4029_p7 = pneg %p4319_p2 }
  0x38   : > { %s4032_s9 = scalar_lea.hbm %s4783_s0, 1024  ;;  %p4033_p13 = scmp.lt.s32.totalorder %s4315_s15, %s4783_s0 }
  0x39   : > { %p4030_p9 = pnand %p4029_p7, %p4028_p11  ;;  %p4034_p0 = scmp.lt.s32.totalorder %s4032_s9, %s4027_s26 }
  0x3b   : > { %p4031_p12 = pneg %p4030_p9  ;;  %p4035_p10 = por %p4034_p0, %p4033_p13 }
  0x3d   : > { %p4036_p3 = pnand %p4035_p10, %p4031_p12 }
  0x3f   : > { %4039 = shalt.err (!%p4036_p3)
}
  0x40   : > { %s4040_s8 = scalar_lea.vmem %s4317_s17, 512  ;;  %s4159_s12 = smov [#allocation2]  }
  0x41   : > { %p4041_p1 = scmp.ne.s32.totalorder %s4317_s17, %s4040_s8  ;;  %s4045_s13 = sshll.u32 %s4159_s12, 4  ;;  %s4046_s13 = int_to_ptr.vmem [resolvable:$false] %s4045_s13 }
  0x42   : > { %s4047_s10 = scalar_lea.vmem %s4046_s13, 1024  ;;  %p4048_p9 = scmp.lt.s32.totalorder %s4317_s17, %s4046_s13 }
  0x43   : > { %p4043_p6 = pnand %p4041_p1, %p4029_p7  ;;  %p4049_p5 = scmp.lt.s32.totalorder %s4047_s10, %s4040_s8 }
  0x45   : > { %p4044_p11 = pneg %p4043_p6  ;;  %p4050_p4 = por %p4049_p5, %p4048_p9 }
  0x47   : > { %p4051_p8 = pnand %p4050_p4, %p4044_p11 }
  0x49   : > { %4054 = shalt.err (!%p4051_p8)
}
  0x4a   : > { %s4803_s26 = smov 8   ;;  %s4804_s11 = smov 128  }
  0x4b   : > { %3844 = dma.hbm_to_vmem [thread:$0]  (!%p4319_p2), %s4315_s15, 512, %s4317_s17, %s4323_s20, %s4804_s11, %s4804_s11, %s4803_s26  }
  0x4c   : > { %p4805_p1 = scmp.ne.s32.totalorder %s4799_s29, 0 }
  0x4d   : > { %s4350_s12 = sand.u32 (!%p4805_p1), 1, %s4145_s22   ;;  %p4806_p4 = scmp.ne.s32.totalorder (!%p4805_p1), %s4797_s27, 0 }
  0x4e   : > { %262 = sbr.rel (%p4805_p1) target bundleno = 3026 (0xbd2), region = 40  ;;  %s4353_s13 = sshll.u32 (!%p4805_p1), %s4350_s12, 5 }
  0x4f   : > { %s265_s18 = scalar_lea.sflag (!%p4805_p1), [#allocation3], %s4350_s12  ;;  %s268_s9 = scalar_lea.vmem (!%p4805_p1), [#allocation2], %s4353_s13 }
  0x53   : > { %4124 = dma.done.wait (%p4806_p4), %s265_s18, 512  }
  0x54   : > { %4126 = vsyncadd (%p4806_p4), %s265_s18, 4294966784  ;;  %p4807_p6 = scmp.eq.s32.totalorder %s4235_s25, 0 }
  0x56   : > { %4128 = dma.done.wait (%p4807_p6), [#allocation6], 1024   ;;  %p4808_p8 = pmov %p4807_p6 }
  0x57   : > { %vm328_vm0 = vcmask 261120   ;;  %v320_v0 = vld [vmem:[#allocation5 + $0x18] sm:$0xff]  ;;  %v319_v1 = vld [vmem:[#allocation5 + $0x10] sm:$0xff]  ;;  %v313_v2 = vld [vmem:[%s268_s9] sm:$0xff]  ;;  %v4160_v8 = vmov 0.0   ;;  %vm4161_vm1 = vmmov 0  }
  0x58   : > { %4130 = vsyncadd (%p4808_p8), [#allocation6], 4294966272  ;;  %3632 = vmatprep.subr.mxu0 %v320_v0  ;;  %v318_v3 = vld [vmem:[#allocation5 + $0x8] sm:$0xff]  ;;  %3640 = vmatprep.mubr.msk.f32.mxu0 %vm328_vm0, %v313_v2  ;;  %v317_v4 = vld [vmem:[#allocation5] sm:$0xff]  ;;  %s4162_s15 = smov 96   ;;  %vm434_vm2 = vcmask 64512  }
  0x59   : > { %3633 = vmatpush3.msra.mxu0 %v320_v0  ;;  %v314_v5 = vld [vmem:[%s268_s9 + $0x8] sm:$0xff]  ;;  %v315_v6 = vld [vmem:[%s268_s9 + $0x10] sm:$0xff]  ;;  %v316_v7 = vld [vmem:[%s268_s9 + $0x18] sm:$0xff]  ;;  %3651 = vmatprep.subr.mxu1 %v4160_v8  ;;  %s4163_s17 = smov 64   ;;  %s4164_s20 = smov 88   ;;  %vm1800_vm3 = vcmask 130112  }
  0x5a   : > { %3634 = vmatprep.subr.mxu0 %v319_v1  ;;  %3653 = vmatprep.mubr.msk.f32.mxu1 %vm4161_vm1, %v4160_v8  ;;  %v3483_v10 = vld [vmem:[%s4785_s2] ss:$0 sm:$0xff]  ;;  %s4165_s14 = smov 120   ;;  %s4471_s16 = scalar_lea.vmem [#allocation9], %s4353_s13  ;;  %vm2497_vm4 = vcmask 195712   ;;  %vm3194_vm5 = vcmask 261312  }
  0x5b   : > { %3635 = vmatpush3.msra.mxu0 %v319_v1  ;;  %s4166_s8 = smov 56   ;;  %s4167_s10 = smov 80  }
  0x5c   : > { %3636 = vmatprep.subr.mxu0 %v318_v3  ;;  %s4168_s26 = smov 112   ;;  %s4169_s11 = smov 48  }
  0x5d   : > { %3637 = vmatpush3.msra.mxu0 %v318_v3  ;;  %s4170_s18 = smov 72   ;;  %s4171_s9 = smov 104  }
  0x5e   : > { %3638 = vmatprep.subr.mxu0 %v317_v4  ;;  %s4172_s27 = smov 40   ;;  %s4173_s29 = smov 8  }
  0x5f   : > { %3639 = vmatpush3.msra.mxu0 %v317_v4  ;;  %p4809_p2 = scmp.ne.s32.totalorder %s4801_s30, 0 }
  0x60   : > { %3641 = vmatmul.mubr.msk.f32.vlgmr.msra.gmra.mxu0 %vm328_vm0, %v314_v5  ;;  %3646 = vmatprep.subr.mxu0 %v4160_v8 }
  0x61   : > { %3643 = vmatprep.mubr.msk.f32.mxu0 %vm328_vm0, %v315_v6 }
  0x64   : > { %3644 = vmatmul.mubr.msk.f32.gmra.mxu0 %vm328_vm0, %v316_v7 }
  0x65   : > { %3648 = vmatprep.mubr.msk.f32.mxu0 %vm4161_vm1, %v4160_v8 }
 0x120   : > { %v3642_v9 = vpop.f32.mrf.mxu0 }
 0x121   : > { %v4381_v15 = vadd.f32 %v3642_v9, %v3483_v10 }
 0x122   : > { %v407_v11 = vpop.f32.mrf.mxu0 }
 0x123   : > { %v4378_v12 = vadd.f32 %v3483_v10, %v407_v11 }
 0x124   : > { %v3645_v13 = vpop.f32.mrf.mxu0 }
 0x125   : > { %432 = vrot.lane.b32.xlu0 %v4378_v12, %s4162_s15  ;;  %v4387_v17 = vadd.f32 %v3645_v13, %v3483_v10 }
 0x126   : > { %v417_v14 = vpop.f32.mrf.mxu0 }
 0x127   : > { %v4383_v16 = vadd.f32 %v3483_v10, %v417_v14 }
 0x129   : > { %587 = vrot.lane.b32.xlu1 %v4383_v16, %s4162_s15  ;;  %510 = vrot.lane.b32.xlu0 %v4381_v15, %s4162_s15 }
 0x12d   : > { %664 = vrot.lane.b32.xlu1 %v4387_v17, %s4162_s15  ;;  %s4174_s15 = smov 16  }
 0x197   : > { %v433_v18 = vpop.permute.xlu0 %432 }
 0x198   : > { %3647 = vmatpush3.xpose.msk.msra.mxu0 %vm434_vm2, %v433_v18 }
 0x199   : > { %3661 = vmatprep.subr.mxu0 %v4160_v8 }
 0x19b   : > { %v588_v19 = vpop.permute.xlu1 %587  ;;  %3649 = vmatmul.mubr.msk.f32.vlgmr.msra.gmra.mxu0 %vm434_vm2, %v4378_v12  ;;  %v511_v20 = vpop.permute.xlu0 %510 }
 0x19c   : > { %3652 = vmatpush3.xpose.msk.msra.mxu1 %vm434_vm2, %v511_v20  ;;  %3663 = vmatprep.mubr.msk.f32.mxu0 %vm4161_vm1, %v4160_v8 }
 0x19d   : > { %3656 = vmatprep.subr.mxu1 %v4160_v8 }
 0x19f   : > { %v665_v21 = vpop.permute.xlu1 %664  ;;  %3654 = vmatmul.mubr.msk.f32.vlgmr.msra.gmra.mxu1 %vm434_vm2, %v4381_v15 }
 0x1a0   : > { %3657 = vmatpush3.xpose.msk.msra.mxu1 %vm434_vm2, %v588_v19  ;;  %3662 = vmatpush3.xpose.msk.msra.mxu0 %vm434_vm2, %v665_v21 }
 0x1a1   : > { %3658 = vmatprep.mubr.msk.f32.mxu1 %vm4161_vm1, %v4160_v8  ;;  %3666 = vmatprep.subr.mxu1 %v4160_v8 }
 0x1a2   : > { %3671 = vmatprep.subr.mxu0 %v4160_v8 }
 0x1a3   : > { %3659 = vmatmul.mubr.msk.f32.vlgmr.msra.gmra.mxu1 %vm434_vm2, %v4383_v16  ;;  %3664 = vmatmul.mubr.msk.f32.vlgmr.msra.gmra.mxu0 %vm434_vm2, %v4387_v17 }
 0x1a4   : > { %3668 = vmatprep.mubr.msk.f32.mxu1 %vm4161_vm1, %v4160_v8  ;;  %3673 = vmatprep.mubr.msk.f32.mxu0 %vm4161_vm1, %v4160_v8 }
 0x25b   : > { %v505_v22 = vpop.f32.mrf.mxu0 }
 0x25c   : > { %v740_v23 = vmul.f32 0.35355338, %v505_v22 }
 0x25d   : > { %v3650_v24 = vpop.f32.mrf.mxu0 }
 0x25e   : > { %v744_v25 = vsel %vm434_vm2, %v740_v23, -inf }
 0x25f   : > { %745 = vmax.xlane.f32.xlu0 %v744_v25  ;;  %v582_v26 = vpop.f32.mrf.mxu1 }
 0x260   : > { %v741_v27 = vmul.f32 0.35355338, %v582_v26 }
 0x261   : > { %v3655_v28 = vpop.f32.mrf.mxu1 }
 0x262   : > { %v747_v29 = vsel %vm434_vm2, %v741_v27, -inf }
 0x263   : > { %v736_v30 = vpop.f32.mrf.mxu0  ;;  %748 = vmax.xlane.f32.xlu1 %v747_v29  ;;  %v659_v31 = vpop.f32.mrf.mxu1 }
 0x264   : > { %v742_v32 = vmul.f32 0.35355338, %v659_v31  ;;  %v743_v35 = vmul.f32 0.35355338, %v736_v30 }
 0x265   : > { %v3660_v33 = vpop.f32.mrf.mxu1  ;;  %v3665_v34 = vpop.f32.mrf.mxu0 }
 0x266   : > { %v750_v36 = vsel %vm434_vm2, %v742_v32, -inf  ;;  %v753_v37 = vsel %vm434_vm2, %v743_v35, -inf }
 0x267   : > { %751 = vmax.xlane.f32.xlu0 %v750_v36 }
 0x26b   : > { %754 = vmax.xlane.f32.xlu0 %v753_v37 }
 0x274   : > { %800 = vrot.lane.b32.xlu1 %v4378_v12, %s4163_s17 }
 0x278   : > { %952 = vrot.lane.b32.xlu1 %v4383_v16, %s4163_s17 }
 0x27c   : > { %1028 = vrot.lane.b32.xlu1 %v4387_v17, %s4163_s17 }
 0x281   : > { %876 = vrot.lane.b32.xlu0 %v4381_v15, %s4163_s17  ;;  %s4175_s17 = smov 24  }
 0x2e8   : > { %v746_v38 = vpop.xlane.xlu0 %745 }
 0x2e9   : > { %v756_v39 = vsub.f32 %v740_v23, %v746_v38 }
 0x2eb   : > { %v760_v40 = vmul.f32 1.442695, %v756_v39 }
 0x2ec   : > { %v749_v41 = vpop.xlane.xlu1 %748 }
 0x2ed   : > { %3911 = vpow2.f32 %v760_v40  ;;  %v757_v42 = vsub.f32 %v741_v27, %v749_v41 }
 0x2ef   : > { %v762_v43 = vmul.f32 1.442695, %v757_v42 }
 0x2f0   : > { %v801_v44 = vpop.permute.xlu1 %800  ;;  %v752_v45 = vpop.xlane.xlu0 %751 }
 0x2f1   : > { %3913 = vpow2.f32 %v762_v43  ;;  %v758_v46 = vsub.f32 %v742_v32, %v752_v45  ;;  %3667 = vmatpush3.msra.mxu1 %v801_v44 }
 0x2f2   : > { %3676 = vmatprep.subr.mxu1 %v4160_v8 }
 0x2f3   : > { %v764_v47 = vmul.f32 1.442695, %v758_v46 }
 0x2f4   : > { %v755_v48 = vpop.xlane.xlu0 %754  ;;  %v953_v60 = vpop.permute.xlu1 %952 }
 0x2f5   : > { %3915 = vpow2.f32 %v764_v47  ;;  %v759_v49 = vsub.f32 %v743_v35, %v755_v48 }
 0x2f7   : > { %v766_v50 = vmul.f32 1.442695, %v759_v49 }
 0x2f8   : > { %v877_v51 = vpop.permute.xlu0 %876  ;;  %v1029_v61 = vpop.permute.xlu1 %1028 }
 0x2f9   : > { %3917 = vpow2.f32 %v766_v50  ;;  %3672 = vmatpush3.msra.mxu0 %v877_v51 }
 0x2fa   : > { %v3912_v52 = vpop.eup %3911  ;;  %3681 = vmatprep.subr.mxu0 %v4160_v8 }
 0x2fb   : > { %v768_v53 = vsel %vm434_vm2, %v3912_v52, 0.0 }
 0x2fc   : > { %769 = vadd.xlane.f32.xlu1 %v768_v53 }
 0x2fe   : > { %v3914_v54 = vpop.eup %3913 }
 0x2ff   : > { %v771_v55 = vsel %vm434_vm2, %v3914_v54, 0.0 }
 0x300   : > { %772 = vadd.xlane.f32.xlu0 %v771_v55 }
 0x302   : > { %v3916_v56 = vpop.eup %3915 }
 0x303   : > { %v774_v57 = vsel %vm434_vm2, %v3916_v56, 0.0 }
 0x304   : > { %775 = vadd.xlane.f32.xlu1 %v774_v57 }
 0x306   : > { %v3918_v58 = vpop.eup %3917 }
 0x307   : > { %v777_v59 = vsel %vm434_vm2, %v3918_v58, 0.0 }
 0x308   : > { %778 = vadd.xlane.f32.xlu0 %v777_v59 }
 0x315   : > { %1188 = vrot.lane.b32.xlu1 %v4381_v15, %s4164_s20 }
 0x319   : > { %1186 = vrot.lane.b32.xlu1 %v4381_v15, %s4165_s14 }
 0x31d   : > { %1344 = vrot.lane.b32.xlu1 %v4387_v17, %s4164_s20 }
 0x31e   : > { %1110 = vrot.lane.b32.xlu0 %v4378_v12, %s4164_s20 }
 0x321   : > { %1342 = vrot.lane.b32.xlu1 %v4387_v17, %s4165_s14 }
 0x322   : > { %1108 = vrot.lane.b32.xlu0 %v4378_v12, %s4165_s14 }
 0x326   : > { %1266 = vrot.lane.b32.xlu0 %v4383_v16, %s4164_s20  ;;  %s4796_s20 = sshll.u32 %s4235_s25, 9 }
 0x32a   : > { %1264 = vrot.lane.b32.xlu0 %v4383_v16, %s4165_s14 }
 0x385   : > { %v770_v62 = vpop.xlane.xlu1 %769 }
 0x386   : > { %3919 = vrcp.f32 %v770_v62 }
 0x389   : > { %v773_v63 = vpop.xlane.xlu0 %772 }
 0x38a   : > { %3921 = vrcp.f32 %v773_v63 }
 0x38d   : > { %v776_v0 = vpop.xlane.xlu1 %775 }
 0x38e   : > { %3923 = vrcp.f32 %v776_v0 }
 0x391   : > { %v779_v1 = vpop.xlane.xlu0 %778  ;;  %v1189_v19 = vpop.permute.xlu1 %1188 }
 0x392   : > { %3925 = vrcp.f32 %v779_v1 }
 0x393   : > { %v3920_v2 = vpop.eup %3919 }
 0x394   : > { %v784_v3 = vmul.f32 %v3920_v2, %v770_v62 }
 0x395   : > { %v1111_v9 = vpop.permute.xlu0 %1110  ;;  %v1187_v28 = vpop.permute.xlu1 %1186 }
 0x396   : > { %v788_v4 = vsub.f32 2.0, %v784_v3 }
 0x397   : > { %v3922_v5 = vpop.eup %3921 }
 0x398   : > { %v792_v6 = vmul.f32 %v3920_v2, %v788_v4  ;;  %v785_v7 = vmul.f32 %v3922_v5, %v773_v63 }
 0x399   : > { %v1109_v23 = vpop.permute.xlu0 %1108  ;;  %v1345_v32 = vpop.permute.xlu1 %1344 }
 0x39a   : > { %v796_v10 = vmul.f32 %v3912_v52, %v792_v6  ;;  %v789_v11 = vsub.f32 2.0, %v785_v7 }
 0x39b   : > { %v3924_v13 = vpop.eup %3923 }
 0x39c   : > { %v793_v14 = vmul.f32 %v3922_v5, %v789_v11  ;;  %v786_v18 = vmul.f32 %v3924_v13, %v776_v0  ;;  %3669 = vmatmul.mubr.msk.f32.vlgmr.msra.gmra.mxu1 %vm434_vm2, %v796_v10 }
 0x39d   : > { %3677 = vmatpush3.msra.mxu1 %v953_v60  ;;  %3678 = vmatprep.mubr.msk.f32.mxu1 %vm4161_vm1, %v4160_v8  ;;  %v1267_v30 = vpop.permute.xlu0 %1266  ;;  %v1343_v34 = vpop.permute.xlu1 %1342 }
 0x39e   : > { %v797_v20 = vmul.f32 %v3914_v54, %v793_v14  ;;  %v790_v21 = vsub.f32 2.0, %v786_v18  ;;  %3686 = vmatprep.subr.mxu1 %v4160_v8 }
 0x39f   : > { %v3926_v22 = vpop.eup %3925 }
 0x3a0   : > { %v794_v24 = vmul.f32 %v3924_v13, %v790_v21  ;;  %v787_v25 = vmul.f32 %v3926_v22, %v779_v1  ;;  %3674 = vmatmul.mubr.msk.f32.vlgmr.msra.gmra.mxu0 %vm434_vm2, %v797_v20 }
 0x3a1   : > { %3682 = vmatpush3.msra.mxu0 %v1029_v61  ;;  %3683 = vmatprep.mubr.msk.f32.mxu0 %vm4161_vm1, %v4160_v8  ;;  %v1265_v33 = vpop.permute.xlu0 %1264 }
 0x3a2   : > { %v798_v26 = vmul.f32 %v3916_v56, %v794_v24  ;;  %v791_v27 = vsub.f32 2.0, %v787_v25  ;;  %3691 = vmatprep.subr.mxu0 %v4160_v8 }
 0x3a4   : > { %v795_v29 = vmul.f32 %v3926_v22, %v791_v27  ;;  %3679 = vmatmul.mubr.msk.f32.vlgmr.msra.gmra.mxu1 %vm434_vm2, %v798_v26 }
 0x3a5   : > { %3687 = vmatpush3.xpose.msk.msra.mxu1 %vm434_vm2, %v1111_v9  ;;  %3688 = vmatprep.mubr.msk.f32.mxu1 %vm4161_vm1, %v4160_v8 }
 0x3a6   : > { %v799_v31 = vmul.f32 %v3918_v58, %v795_v29  ;;  %3696 = vmatprep.subr.mxu1 %v4160_v8 }
 0x3a8   : > { %3684 = vmatmul.mubr.msk.f32.vlgmr.msra.gmra.mxu0 %vm434_vm2, %v799_v31  ;;  %3689 = vmatmul.mubr.msk.f32.vlgmr.msra.gmra.mxu1 %vm434_vm2, %v1109_v23 }
 0x3a9   : > { %3692 = vmatpush3.xpose.msk.msra.mxu0 %vm434_vm2, %v1189_v19  ;;  %3697 = vmatpush3.xpose.msk.msra.mxu1 %vm434_vm2, %v1267_v30 }
 0x3aa   : > { %3693 = vmatprep.mubr.msk.f32.mxu0 %vm4161_vm1, %v4160_v8  ;;  %3698 = vmatprep.mubr.msk.f32.mxu1 %vm4161_vm1, %v4160_v8 }
 0x3ab   : > { %3701 = vmatprep.subr.mxu0 %v4160_v8  ;;  %3706 = vmatprep.subr.mxu1 %v4160_v8 }
 0x3ac   : > { %3694 = vmatmul.mubr.msk.f32.vlgmr.msra.gmra.mxu0 %vm434_vm2, %v1187_v28  ;;  %3699 = vmatmul.mubr.msk.f32.vlgmr.msra.gmra.mxu1 %vm434_vm2, %v1265_v33 }
 0x3ad   : > { %3702 = vmatpush3.xpose.msk.msra.mxu0 %vm434_vm2, %v1345_v32  ;;  %3703 = vmatprep.mubr.msk.f32.mxu0 %vm4161_vm1, %v4160_v8 }
 0x3ae   : > { %3711 = vmatprep.subr.mxu0 %v4160_v8  ;;  %3708 = vmatprep.mubr.msk.f32.mxu1 %vm4161_vm1, %v4160_v8 }
 0x3b0   : > { %3704 = vmatmul.mubr.msk.f32.vlgmr.msra.gmra.mxu0 %vm434_vm2, %v1343_v34 }
 0x3b1   : > { %3713 = vmatprep.mubr.msk.f32.mxu0 %vm4161_vm1, %v4160_v8 }
 0x45c   : > { %v872_v35 = vpop.f32.mrf.mxu1 }
 0x45d   : > { %1104 = vst.msk [vmem:[%s4471_s16] sm:$0xff] %vm434_vm2, %v872_v35 }
 0x45e   : > { %v3670_v36 = vpop.f32.mrf.mxu1 }
 0x460   : > { %v948_v37 = vpop.f32.mrf.mxu0 }
 0x461   : > { %1105 = vst.msk [vmem:[%s4471_s16 + $0x8] sm:$0xff] %vm434_vm2, %v948_v37 }
 0x462   : > { %v3675_v38 = vpop.f32.mrf.mxu0 }
 0x464   : > { %v1024_v39 = vpop.f32.mrf.mxu1 }
 0x465   : > { %1106 = vst.msk [vmem:[%s4471_s16 + $0x10] sm:$0xff] %vm434_vm2, %v1024_v39 }
 0x466   : > { %v3680_v40 = vpop.f32.mrf.mxu1 }
 0x468   : > { %v1100_v41 = vpop.f32.mrf.mxu0  ;;  %v1182_v42 = vpop.f32.mrf.mxu1 }
 0x469   : > { %1107 = vst.msk [vmem:[%s4471_s16 + $0x18] sm:$0xff] %vm434_vm2, %v1100_v41  ;;  %v1420_v43 = vmul.f32 0.35355338, %v1182_v42 }
 0x46a   : > { %v3685_v44 = vpop.f32.mrf.mxu0  ;;  %v3690_v45 = vpop.f32.mrf.mxu1 }
 0x46b   : > { %v1424_v46 = vsel %vm434_vm2, %v1420_v43, -inf }
 0x46c   : > { %v1260_v47 = vpop.f32.mrf.mxu0  ;;  %1425 = vmax.xlane.f32.xlu0 %v1424_v46  ;;  %v1338_v48 = vpop.f32.mrf.mxu1 }
 0x46d   : > { %v1421_v49 = vmul.f32 0.35355338, %v1260_v47  ;;  %v1422_v50 = vmul.f32 0.35355338, %v1338_v48 }
 0x46e   : > { %v3695_v51 = vpop.f32.mrf.mxu0  ;;  %v3700_v52 = vpop.f32.mrf.mxu1 }
 0x46f   : > { %v1427_v53 = vsel %vm434_vm2, %v1421_v49, -inf  ;;  %v1430_v54 = vsel %vm434_vm2, %v1422_v50, -inf }
 0x470   : > { %1428 = vmax.xlane.f32.xlu1 %v1427_v53  ;;  %v1416_v55 = vpop.f32.mrf.mxu0  ;;  %1431 = vmax.xlane.f32.xlu0 %v1430_v54 }
 0x471   : > { %v1423_v56 = vmul.f32 0.35355338, %v1416_v55 }
 0x472   : > { %v3705_v57 = vpop.f32.mrf.mxu0 }
 0x473   : > { %v1433_v58 = vsel %vm434_vm2, %v1423_v56, -inf }
 0x474   : > { %1434 = vmax.xlane.f32.xlu0 %v1433_v58 }
 0x481   : > { %1480 = vrot.lane.b32.xlu1 %v4378_v12, %s4166_s8 }
 0x485   : > { %1632 = vrot.lane.b32.xlu1 %v4383_v16, %s4166_s8 }
 0x489   : > { %1708 = vrot.lane.b32.xlu1 %v4387_v17, %s4166_s8 }
 0x48a   : > { %1556 = vrot.lane.b32.xlu0 %v4381_v15, %s4166_s8 }
 0x4f5   : > { %v1426_v59 = vpop.xlane.xlu0 %1425 }
 0x4f6   : > { %v1436_v60 = vsub.f32 %v1420_v43, %v1426_v59 }
 0x4f8   : > { %v1440_v61 = vmul.f32 1.442695, %v1436_v60 }
 0x4f9   : > { %v1429_v62 = vpop.xlane.xlu1 %1428  ;;  %v1432_v63 = vpop.xlane.xlu0 %1431 }
 0x4fa   : > { %3927 = vpow2.f32 %v1440_v61  ;;  %v1437_v0 = vsub.f32 %v1421_v49, %v1429_v62  ;;  %v1438_v1 = vsub.f32 %v1422_v50, %v1432_v63 }
 0x4fc   : > { %v1442_v2 = vmul.f32 1.442695, %v1437_v0  ;;  %v1444_v3 = vmul.f32 1.442695, %v1438_v1 }
 0x4fd   : > { %v1481_v4 = vpop.permute.xlu1 %1480  ;;  %v1435_v5 = vpop.xlane.xlu0 %1434 }
 0x4fe   : > { %3929 = vpow2.f32 %v1442_v2  ;;  %v1439_v6 = vsub.f32 %v1423_v56, %v1435_v5  ;;  %3707 = vmatpush3.msra.mxu1 %v1481_v4 }
 0x4ff   : > { %3931 = vpow2.f32 %v1444_v3  ;;  %3716 = vmatprep.subr.mxu1 %v4160_v8 }
 0x500   : > { %v1446_v7 = vmul.f32 1.442695, %v1439_v6 }
 0x501   : > { %v1557_v9 = vpop.permute.xlu0 %1556  ;;  %v1633_v22 = vpop.permute.xlu1 %1632 }
 0x502   : > { %3933 = vpow2.f32 %v1446_v7  ;;  %3712 = vmatpush3.msra.mxu0 %v1557_v9 }
 0x503   : > { %3721 = vmatprep.subr.mxu0 %v4160_v8 }
 0x505   : > { %v1709_v23 = vpop.permute.xlu1 %1708 }
 0x507   : > { %v3928_v10 = vpop.eup %3927 }
 0x508   : > { %v1448_v11 = vsel %vm434_vm2, %v3928_v10, 0.0 }
 0x509   : > { %1449 = vadd.xlane.f32.xlu1 %v1448_v11 }
 0x50b   : > { %v3930_v13 = vpop.eup %3929 }
 0x50c   : > { %v3932_v14 = vpop.eup %3931  ;;  %v1451_v18 = vsel %vm434_vm2, %v3930_v13, 0.0 }
 0x50d   : > { %1452 = vadd.xlane.f32.xlu0 %v1451_v18  ;;  %v1454_v19 = vsel %vm434_vm2, %v3932_v14, 0.0 }
 0x50e   : > { %1455 = vadd.xlane.f32.xlu1 %v1454_v19 }
 0x50f   : > { %v3934_v20 = vpop.eup %3933 }
 0x510   : > { %v1457_v21 = vsel %vm434_vm2, %v3934_v20, 0.0 }
 0x511   : > { %1458 = vadd.xlane.f32.xlu0 %v1457_v21 }
 0x51f   : > { %1885 = vrot.lane.b32.xlu1 %v4381_v15, %s4167_s10 }
 0x523   : > { %1883 = vrot.lane.b32.xlu1 %v4381_v15, %s4168_s26 }
 0x527   : > { %2041 = vrot.lane.b32.xlu1 %v4387_v17, %s4167_s10  ;;  %1807 = vrot.lane.b32.xlu0 %v4378_v12, %s4167_s10 }
 0x52b   : > { %2039 = vrot.lane.b32.xlu1 %v4387_v17, %s4168_s26  ;;  %1805 = vrot.lane.b32.xlu0 %v4378_v12, %s4168_s26 }
 0x52f   : > { %1963 = vrot.lane.b32.xlu0 %v4383_v16, %s4167_s10  ;;  %s4693_s10 = scalar_lea.hbm %s4789_s6, %s4796_s20 }
 0x533   : > { %1961 = vrot.lane.b32.xlu0 %v4383_v16, %s4168_s26  ;;  %s3345_s26 = sshll.u32 %s4471_s16, 4  ;;  %s4696_s26 = int_to_ptr.vmem [resolvable:$true] %s3345_s26 }
 0x592   : > { %v1450_v24 = vpop.xlane.xlu1 %1449 }
 0x593   : > { %3935 = vrcp.f32 %v1450_v24 }
 0x596   : > { %v1453_v25 = vpop.xlane.xlu0 %1452 }
 0x597   : > { %v1456_v26 = vpop.xlane.xlu1 %1455  ;;  %3937 = vrcp.f32 %v1453_v25 }
 0x598   : > { %3939 = vrcp.f32 %v1456_v26 }
 0x59a   : > { %v1459_v27 = vpop.xlane.xlu0 %1458 }
 0x59b   : > { %3941 = vrcp.f32 %v1459_v27  ;;  %v1886_v37 = vpop.permute.xlu1 %1885 }
 0x59e   : > { %v1808_v31 = vpop.permute.xlu0 %1807 }
 0x59f   : > { %v1884_v49 = vpop.permute.xlu1 %1883 }
 0x5a0   : > { %v3936_v28 = vpop.eup %3935 }
 0x5a1   : > { %v1464_v29 = vmul.f32 %v3936_v28, %v1450_v24 }
 0x5a2   : > { %v1806_v44 = vpop.permute.xlu0 %1805 }
 0x5a3   : > { %v1468_v30 = vsub.f32 2.0, %v1464_v29  ;;  %v2042_v53 = vpop.permute.xlu1 %2041 }
 0x5a4   : > { %v3938_v32 = vpop.eup %3937 }
 0x5a5   : > { %v3940_v33 = vpop.eup %3939  ;;  %v1472_v34 = vmul.f32 %v3936_v28, %v1468_v30  ;;  %v1465_v35 = vmul.f32 %v3938_v32, %v1453_v25 }
 0x5a6   : > { %v1466_v36 = vmul.f32 %v3940_v33, %v1456_v26  ;;  %v1964_v52 = vpop.permute.xlu0 %1963 }
 0x5a7   : > { %v1476_v38 = vmul.f32 %v3928_v10, %v1472_v34  ;;  %v1469_v39 = vsub.f32 2.0, %v1465_v35  ;;  %v2040_v55 = vpop.permute.xlu1 %2039 }
 0x5a8   : > { %v3942_v40 = vpop.eup %3941  ;;  %v1470_v41 = vsub.f32 2.0, %v1466_v36 }
 0x5a9   : > { %v1473_v42 = vmul.f32 %v3938_v32, %v1469_v39  ;;  %v1467_v43 = vmul.f32 %v3942_v40, %v1459_v27  ;;  %3709 = vmatmul.mubr.msk.f32.vlgmr.msra.gmra.mxu1 %vm434_vm2, %v1476_v38 }
 0x5aa   : > { %v1474_v45 = vmul.f32 %v3940_v33, %v1470_v41  ;;  %3717 = vmatpush3.msra.mxu1 %v1633_v22  ;;  %3718 = vmatprep.mubr.msk.f32.mxu1 %vm4161_vm1, %v4160_v8  ;;  %v1962_v54 = vpop.permute.xlu0 %1961 }
 0x5ab   : > { %v1477_v46 = vmul.f32 %v3930_v13, %v1473_v42  ;;  %v1471_v47 = vsub.f32 2.0, %v1467_v43  ;;  %3726 = vmatprep.subr.mxu1 %v4160_v8 }
 0x5ac   : > { %v1478_v48 = vmul.f32 %v3932_v14, %v1474_v45 }
 0x5ad   : > { %v1475_v50 = vmul.f32 %v3942_v40, %v1471_v47  ;;  %3714 = vmatmul.mubr.msk.f32.vlgmr.msra.gmra.mxu0 %vm434_vm2, %v1477_v46 }
 0x5ae   : > { %3719 = vmatmul.mubr.msk.f32.vlgmr.msra.gmra.mxu1 %vm434_vm2, %v1478_v48  ;;  %3722 = vmatpush3.msra.mxu0 %v1709_v23 }
 0x5af   : > { %v1479_v51 = vmul.f32 %v3934_v20, %v1475_v50  ;;  %3727 = vmatpush3.xpose.msk.msra.mxu1 %vm434_vm2, %v1808_v31  ;;  %3723 = vmatprep.mubr.msk.f32.mxu0 %vm4161_vm1, %v4160_v8 }
 0x5b0   : > { %3728 = vmatprep.mubr.msk.f32.mxu1 %vm4161_vm1, %v4160_v8  ;;  %3731 = vmatprep.subr.mxu0 %v4160_v8 }
 0x5b1   : > { %3736 = vmatprep.subr.mxu1 %v4160_v8  ;;  %3724 = vmatmul.mubr.msk.f32.vlgmr.msra.gmra.mxu0 %vm434_vm2, %v1479_v51 }
 0x5b2   : > { %3729 = vmatmul.mubr.msk.f32.vlgmr.msra.gmra.mxu1 %vm434_vm2, %v1806_v44  ;;  %3732 = vmatpush3.xpose.msk.msra.mxu0 %vm434_vm2, %v1886_v37 }
 0x5b3   : > { %3737 = vmatpush3.xpose.msk.msra.mxu1 %vm434_vm2, %v1964_v52  ;;  %3733 = vmatprep.mubr.msk.f32.mxu0 %vm4161_vm1, %v4160_v8 }
 0x5b4   : > { %3738 = vmatprep.mubr.msk.f32.mxu1 %vm4161_vm1, %v4160_v8  ;;  %3741 = vmatprep.subr.mxu0 %v4160_v8 }
 0x5b5   : > { %3734 = vmatmul.mubr.msk.f32.vlgmr.msra.gmra.mxu0 %vm434_vm2, %v1884_v49  ;;  %3746 = vmatprep.subr.mxu1 %v4160_v8 }
 0x5b6   : > { %3739 = vmatmul.mubr.msk.f32.vlgmr.msra.gmra.mxu1 %vm434_vm2, %v1962_v54  ;;  %3742 = vmatpush3.xpose.msk.msra.mxu0 %vm434_vm2, %v2042_v53 }
 0x5b7   : > { %3743 = vmatprep.mubr.msk.f32.mxu0 %vm4161_vm1, %v4160_v8  ;;  %3751 = vmatprep.subr.mxu0 %v4160_v8 }
 0x5b8   : > { %3748 = vmatprep.mubr.msk.f32.mxu1 %vm4161_vm1, %v4160_v8 }
 0x5b9   : > { %3744 = vmatmul.mubr.msk.f32.vlgmr.msra.gmra.mxu0 %vm434_vm2, %v2040_v55 }
 0x5ba   : > { %3753 = vmatprep.mubr.msk.f32.mxu0 %vm4161_vm1, %v4160_v8 }
 0x669   : > { %v4537_v56 = vpop.f32.mrf.mxu1 }
 0x66b   : > { %v3710_v57 = vpop.f32.mrf.mxu1 }
 0x66d   : > { %v4539_v58 = vpop.f32.mrf.mxu0 }
 0x66e   : > { %v4541_v59 = vpop.f32.mrf.mxu1 }
 0x66f   : > { %v3715_v60 = vpop.f32.mrf.mxu0 }
 0x670   : > { %v3720_v61 = vpop.f32.mrf.mxu1 }
 0x671   : > { %v4543_v62 = vpop.f32.mrf.mxu0 }
 0x672   : > { %v1879_v63 = vpop.f32.mrf.mxu1 }
 0x673   : > { %v2117_v0 = vmul.f32 0.35355338, %v1879_v63  ;;  %v3725_v1 = vpop.f32.mrf.mxu0 }
 0x674   : > { %v3730_v2 = vpop.f32.mrf.mxu1 }
 0x675   : > { %v1957_v3 = vpop.f32.mrf.mxu0  ;;  %v2121_v4 = vsel %vm434_vm2, %v2117_v0, -inf }
 0x676   : > { %v2118_v5 = vmul.f32 0.35355338, %v1957_v3  ;;  %2122 = vmax.xlane.f32.xlu0 %v2121_v4  ;;  %v2035_v6 = vpop.f32.mrf.mxu1 }
 0x677   : > { %v2119_v7 = vmul.f32 0.35355338, %v2035_v6  ;;  %v3735_v9 = vpop.f32.mrf.mxu0 }
 0x678   : > { %v3740_v10 = vpop.f32.mrf.mxu1  ;;  %v2124_v11 = vsel %vm434_vm2, %v2118_v5, -inf }
 0x679   : > { %2125 = vmax.xlane.f32.xlu1 %v2124_v11  ;;  %v2113_v13 = vpop.f32.mrf.mxu0  ;;  %v2127_v14 = vsel %vm434_vm2, %v2119_v7, -inf }
 0x67a   : > { %v2120_v18 = vmul.f32 0.35355338, %v2113_v13  ;;  %2128 = vmax.xlane.f32.xlu0 %v2127_v14 }
 0x67b   : > { %v3745_v19 = vpop.f32.mrf.mxu0 }
 0x67c   : > { %v2130_v20 = vsel %vm434_vm2, %v2120_v18, -inf }
 0x67e   : > { %2131 = vmax.xlane.f32.xlu0 %v2130_v20 }
 0x68a   : > { %2177 = vrot.lane.b32.xlu1 %v4378_v12, %s4169_s11 }
 0x68e   : > { %2329 = vrot.lane.b32.xlu1 %v4383_v16, %s4169_s11 }
 0x692   : > { %2405 = vrot.lane.b32.xlu1 %v4387_v17, %s4169_s11 }
 0x694   : > { %2253 = vrot.lane.b32.xlu0 %v4381_v15, %s4169_s11  ;;  %s3316_s11 = scalar_lea.sflag [#allocation10], %s4350_s12 }
 0x6ff   : > { %v2123_v21 = vpop.xlane.xlu0 %2122 }
 0x700   : > { %v2133_v22 = vsub.f32 %v2117_v0, %v2123_v21 }
 0x702   : > { %v2137_v23 = vmul.f32 1.442695, %v2133_v22  ;;  %v2126_v24 = vpop.xlane.xlu1 %2125 }
 0x703   : > { %v2134_v25 = vsub.f32 %v2118_v5, %v2126_v24  ;;  %v2129_v26 = vpop.xlane.xlu0 %2128 }
 0x704   : > { %3943 = vpow2.f32 %v2137_v23  ;;  %v2135_v27 = vsub.f32 %v2119_v7, %v2129_v26 }
 0x705   : > { %v2139_v28 = vmul.f32 1.442695, %v2134_v25 }
 0x706   : > { %v2141_v29 = vmul.f32 1.442695, %v2135_v27  ;;  %v2178_v30 = vpop.permute.xlu1 %2177 }
 0x707   : > { %3945 = vpow2.f32 %v2139_v28  ;;  %v2132_v31 = vpop.xlane.xlu0 %2131  ;;  %3747 = vmatpush3.msra.mxu1 %v2178_v30 }
 0x708   : > { %3947 = vpow2.f32 %v2141_v29  ;;  %v2136_v32 = vsub.f32 %v2120_v18, %v2132_v31  ;;  %3756 = vmatprep.subr.mxu1 %v4160_v8 }
 0x70a   : > { %v2143_v33 = vmul.f32 1.442695, %v2136_v32  ;;  %v2330_v43 = vpop.permute.xlu1 %2329 }
 0x70b   : > { %v2254_v34 = vpop.permute.xlu0 %2253 }
 0x70c   : > { %3949 = vpow2.f32 %v2143_v33  ;;  %3752 = vmatpush3.msra.mxu0 %v2254_v34 }
 0x70d   : > { %3761 = vmatprep.subr.mxu0 %v4160_v8 }
 0x70e   : > { %v2406_v44 = vpop.permute.xlu1 %2405 }
 0x711   : > { %v3944_v35 = vpop.eup %3943 }
 0x712   : > { %v2145_v36 = vsel %vm434_vm2, %v3944_v35, 0.0 }
 0x713   : > { %2146 = vadd.xlane.f32.xlu1 %v2145_v36 }
 0x714   : > { %v3946_v37 = vpop.eup %3945 }
 0x715   : > { %v3948_v38 = vpop.eup %3947  ;;  %v2148_v39 = vsel %vm434_vm2, %v3946_v37, 0.0 }
 0x716   : > { %2149 = vadd.xlane.f32.xlu0 %v2148_v39  ;;  %v2151_v40 = vsel %vm434_vm2, %v3948_v38, 0.0 }
 0x717   : > { %2152 = vadd.xlane.f32.xlu1 %v2151_v40 }
 0x719   : > { %v3950_v41 = vpop.eup %3949 }
 0x71a   : > { %v2154_v42 = vsel %vm434_vm2, %v3950_v41, 0.0 }
 0x71b   : > { %2155 = vadd.xlane.f32.xlu0 %v2154_v42 }
 0x728   : > { %2582 = vrot.lane.b32.xlu1 %v4381_v15, %s4170_s18 }
 0x72c   : > { %2580 = vrot.lane.b32.xlu1 %v4381_v15, %s4171_s9 }
 0x730   : > { %2738 = vrot.lane.b32.xlu1 %v4387_v17, %s4170_s18 }
 0x731   : > { %2504 = vrot.lane.b32.xlu0 %v4378_v12, %s4170_s18 }
 0x734   : > { %2736 = vrot.lane.b32.xlu1 %v4387_v17, %s4171_s9 }
 0x735   : > { %2502 = vrot.lane.b32.xlu0 %v4378_v12, %s4171_s9 }
 0x739   : > { %2660 = vrot.lane.b32.xlu0 %v4383_v16, %s4170_s18  ;;  %s4055_s18 = scalar_lea.vmem %s4696_s26, 512 }
 0x73a   : > { %p4056_p5 = scmp.ne.s32.totalorder %s4696_s26, %s4055_s18 }
 0x73c   : > { %p4057_p7 = pnand %p4056_p5, %p4809_p2 }
 0x73d   : > { %2658 = vrot.lane.b32.xlu0 %v4383_v16, %s4171_s9  ;;  %s4176_s9 = smov [#allocation9]  }
 0x73e   : > { %p4058_p12 = pneg %p4057_p7 }
 0x79c   : > { %v2147_v45 = vpop.xlane.xlu1 %2146 }
 0x79d   : > { %3951 = vrcp.f32 %v2147_v45 }
 0x79f   : > { %v2150_v46 = vpop.xlane.xlu0 %2149 }
 0x7a0   : > { %v2153_v47 = vpop.xlane.xlu1 %2152  ;;  %3953 = vrcp.f32 %v2150_v46 }
 0x7a1   : > { %3955 = vrcp.f32 %v2153_v47 }
 0x7a4   : > { %v2156_v48 = vpop.xlane.xlu0 %2155  ;;  %v2583_v63 = vpop.permute.xlu1 %2582 }
 0x7a5   : > { %3957 = vrcp.f32 %v2156_v48 }
 0x7a8   : > { %v2505_v51 = vpop.permute.xlu0 %2504  ;;  %v2581_v11 = vpop.permute.xlu1 %2580 }
 0x7aa   : > { %v3952_v49 = vpop.eup %3951 }
 0x7ab   : > { %v2161_v50 = vmul.f32 %v3952_v49, %v2147_v45 }
 0x7ac   : > { %v2503_v4 = vpop.permute.xlu0 %2502  ;;  %v2739_v19 = vpop.permute.xlu1 %2738 }
 0x7ad   : > { %v3954_v52 = vpop.eup %3953  ;;  %v2165_v53 = vsub.f32 2.0, %v2161_v50 }
 0x7ae   : > { %v3956_v54 = vpop.eup %3955  ;;  %v2162_v55 = vmul.f32 %v3954_v52, %v2150_v46 }
 0x7af   : > { %v2169_v57 = vmul.f32 %v3952_v49, %v2165_v53  ;;  %v2163_v60 = vmul.f32 %v3956_v54, %v2153_v47 }
 0x7b0   : > { %v2166_v61 = vsub.f32 2.0, %v2162_v55  ;;  %v2661_v14 = vpop.permute.xlu0 %2660  ;;  %v2737_v21 = vpop.permute.xlu1 %2736 }
 0x7b1   : > { %v2173_v0 = vmul.f32 %v3944_v35, %v2169_v57  ;;  %v2167_v1 = vsub.f32 2.0, %v2163_v60 }
 0x7b2   : > { %v3958_v2 = vpop.eup %3957  ;;  %v2170_v3 = vmul.f32 %v3954_v52, %v2166_v61 }
 0x7b3   : > { %v2171_v5 = vmul.f32 %v3956_v54, %v2167_v1  ;;  %v2164_v6 = vmul.f32 %v3958_v2, %v2156_v48  ;;  %3749 = vmatmul.mubr.msk.f32.vlgmr.msra.gmra.mxu1 %vm434_vm2, %v2173_v0 }
 0x7b4   : > { %v2174_v7 = vmul.f32 %v3946_v37, %v2170_v3  ;;  %3757 = vmatpush3.msra.mxu1 %v2330_v43  ;;  %3758 = vmatprep.mubr.msk.f32.mxu1 %vm4161_vm1, %v4160_v8  ;;  %v2659_v20 = vpop.permute.xlu0 %2658 }
 0x7b5   : > { %v2175_v9 = vmul.f32 %v3948_v38, %v2171_v5  ;;  %v2168_v10 = vsub.f32 2.0, %v2164_v6  ;;  %3766 = vmatprep.subr.mxu1 %v4160_v8 }
 0x7b6   : > { %3754 = vmatmul.mubr.msk.f32.vlgmr.msra.gmra.mxu0 %vm434_vm2, %v2174_v7 }
 0x7b7   : > { %v2172_v13 = vmul.f32 %v3958_v2, %v2168_v10  ;;  %3759 = vmatmul.mubr.msk.f32.vlgmr.msra.gmra.mxu1 %vm434_vm2, %v2175_v9  ;;  %3762 = vmatpush3.msra.mxu0 %v2406_v44 }
 0x7b8   : > { %3767 = vmatpush3.xpose.msk.msra.mxu1 %vm434_vm2, %v2505_v51  ;;  %3763 = vmatprep.mubr.msk.f32.mxu0 %vm4161_vm1, %v4160_v8 }
 0x7b9   : > { %v2176_v18 = vmul.f32 %v3950_v41, %v2172_v13  ;;  %3768 = vmatprep.mubr.msk.f32.mxu1 %vm4161_vm1, %v4160_v8  ;;  %3771 = vmatprep.subr.mxu0 %v4160_v8 }
 0x7ba   : > { %3776 = vmatprep.subr.mxu1 %v4160_v8 }
 0x7bb   : > { %3764 = vmatmul.mubr.msk.f32.vlgmr.msra.gmra.mxu0 %vm434_vm2, %v2176_v18  ;;  %3769 = vmatmul.mubr.msk.f32.vlgmr.msra.gmra.mxu1 %vm434_vm2, %v2503_v4 }
 0x7bc   : > { %3772 = vmatpush3.xpose.msk.msra.mxu0 %vm434_vm2, %v2583_v63  ;;  %3777 = vmatpush3.xpose.msk.msra.mxu1 %vm434_vm2, %v2661_v14 }
 0x7bd   : > { %3773 = vmatprep.mubr.msk.f32.mxu0 %vm4161_vm1, %v4160_v8  ;;  %3778 = vmatprep.mubr.msk.f32.mxu1 %vm4161_vm1, %v4160_v8 }
 0x7be   : > { %3781 = vmatprep.subr.mxu0 %v4160_v8  ;;  %3786 = vmatprep.subr.mxu1 %v4160_v8 }
 0x7bf   : > { %3774 = vmatmul.mubr.msk.f32.vlgmr.msra.gmra.mxu0 %vm434_vm2, %v2581_v11  ;;  %3779 = vmatmul.mubr.msk.f32.vlgmr.msra.gmra.mxu1 %vm434_vm2, %v2659_v20 }
 0x7c0   : > { %3782 = vmatpush3.xpose.msk.msra.mxu0 %vm434_vm2, %v2739_v19  ;;  %3783 = vmatprep.mubr.msk.f32.mxu0 %vm4161_vm1, %v4160_v8 }
 0x7c1   : > { %3791 = vmatprep.subr.mxu0 %v4160_v8  ;;  %3788 = vmatprep.mubr.msk.f32.mxu1 %vm4161_vm1, %v4160_v8 }
 0x7c3   : > { %3784 = vmatmul.mubr.msk.f32.vlgmr.msra.gmra.mxu0 %vm434_vm2, %v2737_v21 }
 0x7c4   : > { %3793 = vmatprep.mubr.msk.f32.mxu0 %vm4161_vm1, %v4160_v8 }
 0x873   : > { %v4601_v22 = vpop.f32.mrf.mxu1 }
 0x875   : > { %v3750_v23 = vpop.f32.mrf.mxu1 }
 0x876   : > { %v4603_v24 = vpop.f32.mrf.mxu0 }
 0x877   : > { %v4605_v25 = vpop.f32.mrf.mxu1 }
 0x878   : > { %v3755_v26 = vpop.f32.mrf.mxu0 }
 0x879   : > { %v3760_v27 = vpop.f32.mrf.mxu1 }
 0x87b   : > { %v4607_v28 = vpop.f32.mrf.mxu0  ;;  %v2576_v29 = vpop.f32.mrf.mxu1 }
 0x87c   : > { %v2814_v30 = vmul.f32 0.35355338, %v2576_v29 }
 0x87d   : > { %v3765_v31 = vpop.f32.mrf.mxu0  ;;  %v3770_v32 = vpop.f32.mrf.mxu1 }
 0x87e   : > { %v2818_v33 = vsel %vm434_vm2, %v2814_v30, -inf }
 0x87f   : > { %v2654_v34 = vpop.f32.mrf.mxu0  ;;  %2819 = vmax.xlane.f32.xlu0 %v2818_v33  ;;  %v2732_v35 = vpop.f32.mrf.mxu1 }
 0x880   : > { %v2815_v36 = vmul.f32 0.35355338, %v2654_v34  ;;  %v2816_v37 = vmul.f32 0.35355338, %v2732_v35 }
 0x881   : > { %v3775_v38 = vpop.f32.mrf.mxu0  ;;  %v3780_v39 = vpop.f32.mrf.mxu1 }
 0x882   : > { %v2821_v40 = vsel %vm434_vm2, %v2815_v36, -inf  ;;  %v2824_v41 = vsel %vm434_vm2, %v2816_v37, -inf  ;;  %v429_v39 = vld [vmem:[#allocation7 + $0x18] sm:$0xff] }
 0x883   : > { %2822 = vmax.xlane.f32.xlu1 %v2821_v40  ;;  %v2810_v42 = vpop.f32.mrf.mxu0  ;;  %2825 = vmax.xlane.f32.xlu0 %v2824_v41  ;;  %v428_v40 = vld [vmem:[#allocation7 + $0x10] sm:$0xff]  ;;  %v427_v41 = vld [vmem:[#allocation7 + $0x8] sm:$0xff] }
 0x884   : > { %v2817_v43 = vmul.f32 0.35355338, %v2810_v42  ;;  %v426_v42 = vld [vmem:[#allocation7] sm:$0xff] }
 0x885   : > { %v3785_v44 = vpop.f32.mrf.mxu0 }
 0x886   : > { %v2827_v45 = vsel %vm434_vm2, %v2817_v43, -inf }
 0x887   : > { %2828 = vmax.xlane.f32.xlu0 %v2827_v45 }
 0x894   : > { %2874 = vrot.lane.b32.xlu1 %v4378_v12, %s4172_s27 }
 0x908   : > { %v2820_v46 = vpop.xlane.xlu0 %2819 }
 0x909   : > { %v2830_v47 = vsub.f32 %v2814_v30, %v2820_v46 }
 0x90b   : > { %v2834_v48 = vmul.f32 1.442695, %v2830_v47 }
 0x90c   : > { %v2823_v49 = vpop.xlane.xlu1 %2822  ;;  %v2826_v50 = vpop.xlane.xlu0 %2825 }
 0x90d   : > { %3959 = vpow2.f32 %v2834_v48  ;;  %v2831_v51 = vsub.f32 %v2815_v36, %v2823_v49  ;;  %v2832_v52 = vsub.f32 %v2816_v37, %v2826_v50 }
 0x90f   : > { %v2836_v53 = vmul.f32 1.442695, %v2831_v51  ;;  %v2838_v54 = vmul.f32 1.442695, %v2832_v52 }
 0x910   : > { %v2875_v55 = vpop.permute.xlu1 %2874  ;;  %v2829_v57 = vpop.xlane.xlu0 %2828 }
 0x911   : > { %3961 = vpow2.f32 %v2836_v53  ;;  %v2833_v60 = vsub.f32 %v2817_v43, %v2829_v57  ;;  %3787 = vmatpush3.msra.mxu1 %v2875_v55 }
 0x912   : > { %3963 = vpow2.f32 %v2838_v54  ;;  %3796 = vmatprep.subr.mxu1 %v4160_v8 }
 0x913   : > { %v2840_v61 = vmul.f32 1.442695, %v2833_v60 }
 0x915   : > { %3965 = vpow2.f32 %v2840_v61 }
 0x91a   : > { %v3960_v12 = vpop.eup %3959 }
 0x91b   : > { %v2842_v63 = vsel %vm434_vm2, %v3960_v12, 0.0 }
 0x91c   : > { %2843 = vadd.xlane.f32.xlu1 %v2842_v63 }
 0x91e   : > { %v4617_v0 = vpop.eup %3961 }
 0x91f   : > { %v4619_v1 = vpop.eup %3963  ;;  %v2845_v2 = vsel %vm434_vm2, %v4617_v0, 0.0 }
 0x920   : > { %2846 = vadd.xlane.f32.xlu0 %v2845_v2  ;;  %v2848_v3 = vsel %vm434_vm2, %v4619_v1, 0.0 }
 0x921   : > { %2849 = vadd.xlane.f32.xlu1 %v2848_v3 }
 0x922   : > { %v4625_v4 = vpop.eup %3965 }
 0x923   : > { %v2851_v5 = vsel %vm434_vm2, %v4625_v4, 0.0 }
 0x924   : > { %2852 = vadd.xlane.f32.xlu0 %v2851_v5 }
 0x932   : > { %3026 = vrot.lane.b32.xlu1 %v4383_v16, %s4172_s27 }
 0x936   : > { %3102 = vrot.lane.b32.xlu1 %v4387_v17, %s4172_s27 }
 0x93a   : > { %1790 = vrot.lane.b32.xlu1 %v4539_v58, %s4173_s29  ;;  %2950 = vrot.lane.b32.xlu0 %v4381_v15, %s4172_s27  ;;  %s4059_s27 = sshll.u32 %s4176_s9, 4  ;;  %s4060_s27 = int_to_ptr.vmem [resolvable:$false] %s4059_s27 }
 0x93b   : > { %p4062_p13 = scmp.lt.s32.totalorder %s4696_s26, %s4060_s27 }
 0x93e   : > { %2487 = vrot.lane.b32.xlu1 %v4603_v24, %s4174_s15  ;;  %1788 = vrot.lane.b32.xlu0 %v4537_v56, %s4173_s29 }
 0x942   : > { %1794 = vrot.lane.b32.xlu1 %v4543_v62, %s4173_s29  ;;  %2485 = vrot.lane.b32.xlu0 %v4601_v22, %s4174_s15 }
 0x946   : > { %2491 = vrot.lane.b32.xlu1 %v4607_v28, %s4174_s15  ;;  %1792 = vrot.lane.b32.xlu0 %v4541_v59, %s4173_s29 }
 0x94a   : > { %2489 = vrot.lane.b32.xlu0 %v4605_v25, %s4174_s15  ;;  %s4061_s15 = scalar_lea.vmem %s4060_s27, 1024 }
 0x94b   : > { %p4063_p0 = scmp.lt.s32.totalorder %s4061_s15, %s4055_s18 }
 0x94d   : > { %p4064_p10 = por %p4063_p0, %p4062_p13 }
 0x94f   : > { %p4065_p3 = pnand %p4064_p10, %p4058_p12 }
 0x9a5   : > { %v2844_v16 = vpop.xlane.xlu1 %2843 }
 0x9a6   : > { %3967 = vrcp.f32 %v2844_v16 }
 0x9a9   : > { %v2847_v15 = vpop.xlane.xlu0 %2846 }
 0x9aa   : > { %v2850_v17 = vpop.xlane.xlu1 %2849  ;;  %3969 = vrcp.f32 %v2847_v15 }
 0x9ab   : > { %3971 = vrcp.f32 %v2850_v17 }
 0x9ad   : > { %v2853_v56 = vpop.xlane.xlu0 %2852 }
 0x9ae   : > { %v3027_v58 = vpop.permute.xlu1 %3026  ;;  %3973 = vrcp.f32 %v2853_v56 }
 0x9b1   : > { %v2951_v62 = vpop.permute.xlu0 %2950 }
 0x9b2   : > { %v3103_v6 = vpop.permute.xlu1 %3102  ;;  %3792 = vmatpush3.msra.mxu0 %v2951_v62 }
 0x9b3   : > { %v3968_v7 = vpop.eup %3967  ;;  %3801 = vmatprep.subr.mxu0 %v4160_v8 }
 0x9b4   : > { %v2858_v59 = vmul.f32 %v3968_v7, %v2844_v16 }
 0x9b5   : > { %v1789_v9 = vpop.permute.xlu0 %1788 }
 0x9b6   : > { %v2862_v10 = vsub.f32 2.0, %v2858_v59  ;;  %v1791_v11 = vpop.permute.xlu1 %1790  ;;  %1801 = vst.msk [vmem:[%s4471_s16] sm:$0xff] %vm1800_vm3, %v1789_v9 }
 0x9b7   : > { %v3970_v13 = vpop.eup %3969  ;;  %1802 = vst.msk [vmem:[%s4471_s16 + $0x8] sm:$0xff] %vm1800_vm3, %v1791_v11 }
 0x9b8   : > { %v3972_v14 = vpop.eup %3971  ;;  %v2866_v18 = vmul.f32 %v3968_v7, %v2862_v10  ;;  %v2859_v19 = vmul.f32 %v3970_v13, %v2847_v15 }
 0x9b9   : > { %v2860_v20 = vmul.f32 %v3972_v14, %v2850_v17  ;;  %v2486_v21 = vpop.permute.xlu0 %2485 }
 0x9ba   : > { %v2870_v22 = vmul.f32 %v3960_v12, %v2866_v18  ;;  %v2863_v23 = vsub.f32 2.0, %v2859_v19  ;;  %v2488_v24 = vpop.permute.xlu1 %2487  ;;  %2498 = vst.msk [vmem:[%s4471_s16] sm:$0xff] %vm2497_vm4, %v2486_v21 }
 0x9bb   : > { %v3974_v25 = vpop.eup %3973  ;;  %v2864_v26 = vsub.f32 2.0, %v2860_v20  ;;  %2499 = vst.msk [vmem:[%s4471_s16 + $0x8] sm:$0xff] %vm2497_vm4, %v2488_v24 }
 0x9bc   : > { %v2867_v27 = vmul.f32 %v3970_v13, %v2863_v23  ;;  %v2861_v28 = vmul.f32 %v3974_v25, %v2853_v56  ;;  %3789 = vmatmul.mubr.msk.f32.vlgmr.msra.gmra.mxu1 %vm434_vm2, %v2870_v22 }
 0x9bd   : > { %v2868_v29 = vmul.f32 %v3972_v14, %v2864_v26  ;;  %3797 = vmatpush3.msra.mxu1 %v3027_v58  ;;  %v1793_v30 = vpop.permute.xlu0 %1792  ;;  %3798 = vmatprep.mubr.msk.f32.mxu1 %vm4161_vm1, %v4160_v8 }
 0x9be   : > { %v2871_v31 = vmul.f32 %v4617_v0, %v2867_v27  ;;  %v2865_v32 = vsub.f32 2.0, %v2861_v28  ;;  %v1795_v33 = vpop.permute.xlu1 %1794  ;;  %1803 = vst.msk [vmem:[%s4471_s16 + $0x10] sm:$0xff] %vm1800_vm3, %v1793_v30  ;;  %3806 = vmatprep.subr.mxu1 %v429_v39 }
 0x9bf   : > { %v2872_v34 = vmul.f32 %v4619_v1, %v2868_v29  ;;  %1804 = vst.msk [vmem:[%s4471_s16 + $0x18] sm:$0xff] %vm1800_vm3, %v1795_v33 }
 0x9c0   : > { %v2869_v35 = vmul.f32 %v3974_v25, %v2865_v32  ;;  %3794 = vmatmul.mubr.msk.f32.vlgmr.msra.gmra.mxu0 %vm434_vm2, %v2871_v31 }
 0x9c1   : > { %3799 = vmatmul.mubr.msk.f32.vlgmr.msra.gmra.mxu1 %vm434_vm2, %v2872_v34  ;;  %3802 = vmatpush3.msra.mxu0 %v3103_v6  ;;  %v2490_v36 = vpop.permute.xlu0 %2489 }
 0x9c2   : > { %v2873_v37 = vmul.f32 %v4625_v4, %v2869_v35  ;;  %v2492_v38 = vpop.permute.xlu1 %2491  ;;  %2500 = vst.msk [vmem:[%s4471_s16 + $0x10] sm:$0xff] %vm2497_vm4, %v2490_v36  ;;  %3803 = vmatprep.mubr.msk.f32.mxu0 %vm4161_vm1, %v4160_v8  ;;  %3807 = vmatpush3.msra.mxu1 %v429_v39 }
 0x9c3   : > { %2501 = vst.msk [vmem:[%s4471_s16 + $0x18] sm:$0xff] %vm2497_vm4, %v2492_v38  ;;  %3808 = vmatprep.subr.mxu1 %v428_v40 }
 0x9c4   : > { %3804 = vmatmul.mubr.msk.f32.vlgmr.msra.gmra.mxu0 %vm434_vm2, %v2873_v37  ;;  %3809 = vmatpush3.msra.mxu1 %v428_v40 }
 0x9c5   : > { %3810 = vmatprep.subr.mxu1 %v427_v41 }
 0x9c6   : > { %3811 = vmatpush3.msra.mxu1 %v427_v41 }
 0x9c7   : > { %3812 = vmatprep.subr.mxu1 %v426_v42 }
 0x9c8   : > { %3813 = vmatpush3.msra.mxu1 %v426_v42 }
 0xa7c   : > { %v2946_v43 = vpop.f32.mrf.mxu1 }
 0xa7d   : > { %3182 = vrot.lane.b32.xlu0 %v2946_v43, %s4175_s17 }
 0xa7e   : > { %v3790_v8 = vpop.f32.mrf.mxu1 }
 0xa80   : > { %v3022_v44 = vpop.f32.mrf.mxu0 }
 0xa81   : > { %v3098_v45 = vpop.f32.mrf.mxu1  ;;  %3184 = vrot.lane.b32.xlu1 %v3022_v44, %s4175_s17 }
 0xa82   : > { %3186 = vrot.lane.b32.xlu0 %v3098_v45, %s4175_s17  ;;  %v3795_v46 = vpop.f32.mrf.mxu0 }
 0xa83   : > { %v3800_v47 = vpop.f32.mrf.mxu1 }
 0xa84   : > { %v3174_v48 = vpop.f32.mrf.mxu0 }
 0xa85   : > { %3188 = vrot.lane.b32.xlu1 %v3174_v48, %s4175_s17 }
 0xa86   : > { %v3805_v49 = vpop.f32.mrf.mxu0 }
 0xaef   : > { %v3183_v50 = vpop.permute.xlu0 %3182 }
 0xaf0   : > { %3195 = vst.msk [vmem:[%s4471_s16] sm:$0xff] %vm3194_vm5, %v3183_v50 }
 0xaf3   : > { %v3185_v51 = vpop.permute.xlu1 %3184 }
 0xaf4   : > { %3196 = vst.msk [vmem:[%s4471_s16 + $0x8] sm:$0xff] %vm3194_vm5, %v3185_v51  ;;  %v3187_v52 = vpop.permute.xlu0 %3186 }
 0xaf5   : > { %3197 = vst.msk [vmem:[%s4471_s16 + $0x10] sm:$0xff] %vm3194_vm5, %v3187_v52 }
 0xaf7   : > { %v3189_v53 = vpop.permute.xlu1 %3188  ;;  %v3199_v54 = vld [vmem:[%s4471_s16] sm:$0xff] }
 0xaf8   : > { %3198 = vst.msk [vmem:[%s4471_s16 + $0x18] sm:$0xff] %vm3194_vm5, %v3189_v53  ;;  %3814 = vmatprep.mubr.msk.f32.mxu1 %vm328_vm0, %v3199_v54 }
 0xafb   : > { %v3200_v55 = vld [vmem:[%s4471_s16 + $0x8] sm:$0xff] }
 0xafc   : > { %3815 = vmatmul.mubr.msk.f32.vlgmr.msra.gmra.mxu1 %vm328_vm0, %v3200_v55  ;;  %v3201_v57 = vld [vmem:[%s4471_s16 + $0x10] sm:$0xff] }
 0xafd   : > { %3817 = vmatprep.mubr.msk.f32.mxu1 %vm328_vm0, %v3201_v57 }
 0xaff   : > { %v3202_v60 = vld [vmem:[%s4471_s16 + $0x18] sm:$0xff] }
 0xb00   : > { %3818 = vmatmul.mubr.msk.f32.gmra.mxu1 %vm328_vm0, %v3202_v60 }
 0xb01   : > { %4068 = shalt.err (!%p4065_p3)
}
 0xb02   : > { %s4069_s16 = scalar_lea.hbm %s4693_s10, 512  ;;  %s4073_s8 = scalar_lea.hbm %s4789_s6, 1024 }
 0xb03   : > { %p4070_p11 = scmp.ne.s32.totalorder %s4693_s10, %s4069_s16  ;;  %p4074_p4 = scmp.lt.s32.totalorder %s4693_s10, %s4789_s6 }
 0xb04   : > { %p4075_p6 = scmp.lt.s32.totalorder %s4073_s8, %s4069_s16 }
 0xb05   : > { %p4071_p9 = pnand %p4070_p11, %p4809_p2 }
 0xb06   : > { %p4076_p8 = por %p4075_p6, %p4074_p4 }
 0xb07   : > { %p4072_p1 = pneg %p4071_p9 }
 0xb09   : > { %p4077_p5 = pnand %p4076_p8, %p4072_p1 }
 0xb0b   : > { %4080 = shalt.err (!%p4077_p5)
}
 0xb0c   : > { %s4177_s18 = smov 128   ;;  %v3536_v61 = vld [vmem:[%s4787_s4] ss:$0 sm:$0xff]  ;;  %s302_s20 = scalar_lea.vmem [#allocation8], %s4353_s13 }
 0xb0d   : > { %3831 = dma.vmem_to_hbm [thread:$0]  (%p4809_p2), %s4696_s26, 512, %s4693_s10, %s3316_s11, %s4177_s18, %s4177_s18, %s4173_s29  }
 0xb0e   : > { %s3329_s16 = sshll.u32 %s302_s20, 4  ;;  %s4810_s10 = sshll.u32 %s4235_s25, 9  ;;  %s4730_s16 = int_to_ptr.vmem [resolvable:$true] %s3329_s16 }
 0xb0f   : > { %s4738_s11 = scalar_lea.hbm %s4788_s5, %s4810_s10  ;;  %s3311_s17 = scalar_lea.sflag [#allocation4], %s4350_s12 }
 0xb10   : > { %s4081_s14 = scalar_lea.vmem %s4730_s16, 512  ;;  %s4178_s8 = smov [#allocation8]  }
 0xb11   : > { %p4082_p7 = scmp.ne.s32.totalorder %s4730_s16, %s4081_s14  ;;  %s4085_s9 = sshll.u32 %s4178_s8, 4  ;;  %s4086_s9 = int_to_ptr.vmem [resolvable:$false] %s4085_s9 }
 0xb12   : > { %s4087_s27 = scalar_lea.vmem %s4086_s9, 1024  ;;  %p4088_p0 = scmp.lt.s32.totalorder %s4730_s16, %s4086_s9 }
 0xb13   : > { %p4083_p12 = pnand %p4082_p7, %p4809_p2  ;;  %p4089_p10 = scmp.lt.s32.totalorder %s4087_s27, %s4081_s14 }
 0xb15   : > { %p4084_p13 = pneg %p4083_p12  ;;  %p4090_p3 = por %p4089_p10, %p4088_p0 }
 0xb17   : > { %p4091_p11 = pnand %p4090_p3, %p4084_p13 }
 0xbbc   : > { %v3816_v12 = vpop.f32.mrf.mxu1 }
 0xbbd   : > { %v3293_v63 = vadd.f32 %v3816_v12, %v3536_v61 }
 0xbbe   : > { %v3287_v0 = vpop.f32.mrf.mxu1 }
 0xbbf   : > { %3307 = vst.msk [vmem:[%s302_s20 + $0x8] sm:$0xff] %vm328_vm0, %v3293_v63  ;;  %v3288_v1 = vadd.f32 %v3536_v61, %v3287_v0 }
 0xbc0   : > { %v3819_v2 = vpop.f32.mrf.mxu1 }
 0xbc1   : > { %3306 = vst.msk [vmem:[%s302_s20] sm:$0xff] %vm328_vm0, %v3288_v1  ;;  %v3303_v3 = vadd.f32 %v3819_v2, %v3536_v61 }
 0xbc2   : > { %v3297_v4 = vpop.f32.mrf.mxu1 }
 0xbc3   : > { %3309 = vst.msk [vmem:[%s302_s20 + $0x18] sm:$0xff] %vm328_vm0, %v3303_v3  ;;  %v3298_v5 = vadd.f32 %v3536_v61, %v3297_v4 }
 0xbc5   : > { %3308 = vst.msk [vmem:[%s302_s20 + $0x10] sm:$0xff] %vm328_vm0, %v3298_v5 }
 0xbc6   : > { %4094 = shalt.err (!%p4091_p11)
}
 0xbc7   : > { %s4095_s25 = scalar_lea.hbm %s4738_s11, 512  ;;  %s4099_s20 = scalar_lea.hbm %s4788_s5, 1024 }
 0xbc8   : > { %p4096_p9 = scmp.ne.s32.totalorder %s4738_s11, %s4095_s25  ;;  %p4100_p6 = scmp.lt.s32.totalorder %s4738_s11, %s4788_s5 }
 0xbc9   : > { %p4101_p8 = scmp.lt.s32.totalorder %s4099_s20, %s4095_s25 }
 0xbca   : > { %p4097_p1 = pnand %p4096_p9, %p4809_p2 }
 0xbcb   : > { %p4102_p5 = por %p4101_p8, %p4100_p6 }
 0xbcc   : > { %p4098_p4 = pneg %p4097_p1 }
 0xbce   : > { %p4103_p7 = pnand %p4102_p5, %p4098_p4 }
 0xbd0   : > { %4106 = shalt.err (!%p4103_p7)
}
 0xbd1   : > { %3830 = dma.vmem_to_hbm [thread:$0]  (%p4809_p2), %s4730_s16, 512, %s4738_s11, %s3311_s17, %s4177_s18, %s4177_s18, %s4173_s29  }
 0xbd2 PF: > { %s3360_s26 = sand.u32 1, %s4141_s21   ;;  %p4811_p12 = scmp.ne.s32.totalorder %s4798_s28, 0 }
 0xbd3   : > { %p4812_p13 = scmp.ge.s32.totalorder %s4153_s24, 2  ;;  %s3361_s14 = scalar_lea.sflag [#allocation4], %s3360_s26 }
 0xbd5   : > { %p3846_p0 = pnand %p4812_p13, %p4811_p12 }
 0xbd7   : > { %p3847_p10 = pneg %p3846_p0 }
 0xbd9   : > { %4132 = dma.done.wait (%p3847_p10), %s3361_s14, 512  }
 0xbda   : > { %4134 = vsyncadd (%p3847_p10), %s3361_s14, 4294966784  ;;  %s3370_s8 = scalar_lea.sflag [#allocation10], %s3360_s26 }
 0xbdb   : > { %4136 = dma.done.wait (%p3847_p10), %s3370_s8, 512  }
 0xbdc   : > { %4138 = vsyncadd (%p3847_p10), %s3370_s8, 4294966784  ;;  %p24_p2 = scmp.ge.s32.totalorder %s4292_s19, 4   ;;  %s4813_s21 = smov %s4145_s22 }
 0xbdd   : > { %s4814_s22 = smov %s4149_s23  ;;  %s4815_s23 = smov %s4308_s7 }
 0xbde   : > { %s4816_s24 = smov %s4292_s19  ;;  %26 = sbr.rel (!%p24_p2) target bundleno = 8 (0x8), region = 110 }
 0xbe3   :  { %3375 = vsyncpa [#allocation3], 1 }
 0xbe4   :  { %3377 = vsyncpa [#allocation3 + $0x1], 1 }
 0xbe5   :  { %3378 = vsyncpa [#allocation6], 1 }
 0xbe6   :  { %3379 = vsyncpa [#allocation4], 1 }
 0xbe7   :  { %3381 = vsyncpa [#allocation4 + $0x1], 1 }
 0xbe8   :  { %3382 = vsyncpa [#allocation10], 1 }
 0xbe9   :  { %3384 = vsyncpa [#allocation10 + $0x1], 1 }

</bundles_post_ra>
